<compile_context>
chip_gen: v6e
topology: v6e:2x2x1
jax: 0.10.0
libtpu: 0.0.40
codegen_flags: <defaults>
</compile_context>

<pallas_src>
import functools

import jax
import jax.numpy as jnp
from jax import lax
from jax.experimental import pallas as pl
from jax.experimental.pallas import tpu as pltpu


def char_lstm_kernel(ids_ref, embed_ref, w_ih_ref, w_hh_ref, b_ref,
                     w_fc_ref, b_fc_ref,
                     logits_ref, hn_ref, cn_ref,
                     seq_ref, gates_ref,
                     *, T, B, H, V, L, use_bf16_act):
    """One batch block.  B = per-block padded batch (mult of 8), V = lane-padded vocab."""
    f32 = jnp.float32
    bf16 = jnp.bfloat16
    TB = T * B

    # ---- embedding via one-hot matmul (lane-dense Vp, bf16 MXU operands) ----
    # TODO(synk): for vocabularies much larger than 128 replace the one-hot
    # matmul with a gather (scalar-prefetched ids + pl.Element row gather).
    ids = ids_ref[...]                                              # (TB, 1) int32
    tok = lax.broadcasted_iota(jnp.int32, (TB, V), 1)
    onehot = (tok == ids).astype(bf16)                              # (TB, Vp)
    emb = jnp.dot(onehot, embed_ref[...], preferred_element_type=f32)   # (TB, H) f32

    # ---- stacked LSTM layers ----
    for l in range(L):
        # Hoisted input projection: ONE big GEMM per layer, off the serial path.
        if l == 0:
            x_all = emb.astype(bf16)                                # (TB, H)
        else:
            x_all = seq_ref[...]                                    # (TB, H) bf16
        gates_ref[...] = (
            jnp.dot(x_all, w_ih_ref[l], preferred_element_type=f32)
            + b_ref[l]                                              # b_ih + b_hh (f32)
        ).astype(bf16)                                              # (TB, 4H)

        w_hh = w_hh_ref[l]                                          # (H, 4H) bf16
        # TODO(synk): drive this recurrent matmul with explicit MXU staging
        # (pltpu.matmul_push_rhs once before the loop, matmul_acc_lhs/matmul_pop
        # per step) so the constant W_hh is not re-pushed every time step.

        def step(t, carry, w_hh=w_hh):
            h, c = carry                                  # h (B,H) bf16, c (B,H) f32
            off = pl.multiple_of(t * B, 8)
            pre = (gates_ref[pl.ds(off, B), :].astype(f32)
                   + jnp.dot(h, w_hh, preferred_element_type=f32))  # (B, 4H) f32
            # Gate order (i, f, o, g): one sigmoid over 3H lanes, one tanh over H.
            if use_bf16_act:
                # bf16 EUP path (v6e/v7x); cell-state update stays f32.
                act = pre.astype(bf16)
                sig = jax.nn.sigmoid(act[:, :3 * H])
                g_g = jnp.tanh(act[:, 3 * H:])
                i_g = sig[:, :H].astype(f32)
                f_g = sig[:, H:2 * H].astype(f32)
                o_g = sig[:, 2 * H:3 * H]                            # bf16
                c_new = f_g * c + i_g * g_g.astype(f32)
                h_new = (o_g * jnp.tanh(c_new.astype(bf16))).astype(bf16)
            else:
                # f32 path (v5e: no bf16 EUP).
                sig = jax.nn.sigmoid(pre[:, :3 * H])
                g_g = jnp.tanh(pre[:, 3 * H:])
                i_g = sig[:, :H]
                f_g = sig[:, H:2 * H]
                o_g = sig[:, 2 * H:3 * H]
                c_new = f_g * c + i_g * g_g
                h_new = (o_g * jnp.tanh(c_new)).astype(bf16)
            # Safe to overwrite: this layer's input was already consumed into
            # gates_ref by the hoisted GEMM above.
            seq_ref[pl.ds(off, B), :] = h_new
            return (h_new, c_new)

        h0 = jnp.zeros((B, H), bf16)
        c0 = jnp.zeros((B, H), f32)
        h_f, c_f = lax.fori_loop(0, T, step, (h0, c0), unroll=min(T, 8))
        hn_ref[l] = h_f.astype(f32)
        cn_ref[l] = c_f

    # ---- final linear head: lane-dense Vp columns, bf16 writeback ----
    out_all = seq_ref[...]                                          # (TB, H) bf16
    logits = (jnp.dot(out_all, w_fc_ref[...], preferred_element_type=f32)
              + b_fc_ref[...])                                      # (TB, Vp) f32
    logits_ref[...] = logits.astype(logits_ref.dtype)


def _round_up(x, m):
    return (x + m - 1) // m * m


def _reorder_gates(w, H):
    """Reorder last-axis gate columns from torch (i, f, g, o) to (i, f, o, g)."""
    i = w[..., 0 * H:1 * H]
    f = w[..., 1 * H:2 * H]
    g = w[..., 2 * H:3 * H]
    o = w[..., 3 * H:4 * H]
    return jnp.concatenate([i, f, o, g], axis=-1)


def _tpu_kind():
    try:
        return jax.devices()[0].device_kind.lower()
    except Exception:
        return ""


@jax.jit
def char_lstm_forward(x_ids, params):
    """x_ids: (B, T) int32 token ids.  Returns (logits (B,T,V), (h_n, c_n))."""
    B, T = x_ids.shape
    embed = params["embed"]            # (V, H)
    V, H = embed.shape
    w_ihT = params["w_ihT"]            # (L, H, 4H), gate order (i,f,g,o)
    w_hhT = params["w_hhT"]            # (L, H, 4H)
    b = params["b"]                    # (L, 1, 4H) == b_ih + b_hh
    w_fcT = params["w_fcT"]            # (H, V)
    b_fc = params["b_fc"]              # (1, V)
    L = w_ihT.shape[0]

    # ---- generation-aware knobs (trace-time, Python level) ----
    kind = _tpu_kind()
    num_tc = 2 if "v7" in kind else 1                 # only v7x has 2 TCs per chip
    use_bf16_act = ("v6" in kind) or ("v7" in kind)   # bf16 EUP on v6e/v7x
    vmem_limit = (48 if "v7" in kind else 96) * 1024 * 1024

    # ---- geometry: batch blocks, sublane/lane padding ----
    # Split across TensorCores only when it does not inflate the 8-sublane padding.
    NB = num_tc
    if NB > 1 and _round_up(-(-B // NB), 8) * NB > _round_up(B, 8):
        NB = 1
    Bblk = _round_up(-(-B // NB), 8)              # per-block batch, 8-sublane aligned
    B_pad = NB * Bblk
    Vp = _round_up(V, 128)                        # lane-dense logits / one-hot
    TB = T * Bblk

    # ---- weight prep: gate reorder, bf16 MXU operands, vocab padding ----
    bf16 = jnp.bfloat16
    f32 = jnp.float32
    embed_p = jnp.zeros((Vp, H), bf16).at[:V].set(embed.astype(bf16))
    w_ih_p = _reorder_gates(w_ihT, H).astype(bf16)
    w_hh_p = _reorder_gates(w_hhT, H).astype(bf16)
    b_p = _reorder_gates(b, H).astype(f32)
    w_fc_p = jnp.zeros((H, Vp), bf16).at[:, :V].set(w_fcT.astype(bf16))
    b_fc_p = jnp.zeros((1, Vp), f32).at[:, :V].set(b_fc.astype(f32))

    # ids: pad batch, split into blocks, time-major and flattened (row = t*Bblk + b).
    ids_p = jnp.zeros((B_pad, T), jnp.int32).at[:B].set(x_ids.astype(jnp.int32))
    ids_blk = (ids_p.reshape(NB, Bblk, T)
               .transpose(0, 2, 1)
               .reshape(NB, TB, 1))

    kernel = functools.partial(char_lstm_kernel, T=T, B=Bblk, H=H, V=Vp, L=L,
                               use_bf16_act=use_bf16_act)

    grid_spec = pltpu.PrefetchScalarGridSpec(
        num_scalar_prefetch=0,
        grid=(NB,),
        in_specs=[
            pl.BlockSpec((None, TB, 1), lambda nb: (nb, 0, 0)),     # ids (flattened)
            pl.BlockSpec((Vp, H), lambda nb: (0, 0)),               # embed
            pl.BlockSpec((L, H, 4 * H), lambda nb: (0, 0, 0)),      # w_ih
            pl.BlockSpec((L, H, 4 * H), lambda nb: (0, 0, 0)),      # w_hh
            pl.BlockSpec((L, 1, 4 * H), lambda nb: (0, 0, 0)),      # bias
            pl.BlockSpec((H, Vp), lambda nb: (0, 0)),               # w_fc
            pl.BlockSpec((1, Vp), lambda nb: (0, 0)),               # b_fc
        ],
        out_specs=(
            pl.BlockSpec((None, TB, Vp), lambda nb: (nb, 0, 0)),    # logits (per-block 2-D)
            pl.BlockSpec((L, Bblk, H), lambda nb: (0, nb, 0)),      # h_n
            pl.BlockSpec((L, Bblk, H), lambda nb: (0, nb, 0)),      # c_n
        ),
        scratch_shapes=[
            pltpu.VMEM((TB, H), bf16),        # layer-I/O sequence buffer (no reshapes)
            pltpu.VMEM((TB, 4 * H), bf16),    # hoisted gate pre-activations
        ],
    )

    logits_blk, h_n, c_n = pl.pallas_call(
        kernel,
        out_shape=(
            jax.ShapeDtypeStruct((NB, TB, Vp), bf16),
            jax.ShapeDtypeStruct((L, B_pad, H), f32),
            jax.ShapeDtypeStruct((L, B_pad, H), f32),
        ),
        grid_spec=grid_spec,
        compiler_params=pltpu.CompilerParams(
            dimension_semantics=("parallel",),
            vmem_limit_bytes=vmem_limit,
        ),
    )(ids_blk, embed_p, w_ih_p, w_hh_p, b_p, w_fc_p, b_fc_p)

    # Back to batch_first, strip batch / vocab padding, restore f32 logits.
    logits = (logits_blk.reshape(NB, T, Bblk, Vp)
              .transpose(0, 2, 1, 3)
              .reshape(B_pad, T, Vp)[:B, :, :V]
              .astype(f32))
    return logits, (h_n[:, :B, :], c_n[:, :B, :])


def char_lstm_reference(x_ids, params):
    """Pure-JAX f32 reference with torch.nn.LSTM semantics (for a sanity check)."""
    embed = params["embed"]
    V, H = embed.shape
    w_ihT, w_hhT, b = params["w_ihT"], params["w_hhT"], params["b"]
    w_fcT, b_fc = params["w_fcT"], params["b_fc"]
    L = w_ihT.shape[0]
    B, T = x_ids.shape
    x = embed[x_ids]                                   # (B, T, H)
    h_all, c_all = [], []
    for l in range(L):
        h = jnp.zeros((B, H), jnp.float32)
        c = jnp.zeros((B, H), jnp.float32)
        outs = []
        for t in range(T):
            g = x[:, t] @ w_ihT[l] + h @ w_hhT[l] + b[l]
            i = jax.nn.sigmoid(g[:, :H])
            f = jax.nn.sigmoid(g[:, H:2 * H])
            gg = jnp.tanh(g[:, 2 * H:3 * H])
            o = jax.nn.sigmoid(g[:, 3 * H:])
            c = f * c + i * gg
            h = o * jnp.tanh(c)
            outs.append(h)
        x = jnp.stack(outs, axis=1)
        h_all.append(h)
        c_all.append(c)
    logits = x @ w_fcT + b_fc
    return logits, (jnp.stack(h_all), jnp.stack(c_all))


def init_params(key, vocab_size, hidden_size, num_layers):
    """Deterministic synthetic parameters with the shapes nn.__init__ implies."""
    V, H, L = vocab_size, hidden_size, num_layers
    s = 1.0 / float(H) ** 0.5
    ks = jax.random.split(key, 7)
    embed = jax.random.normal(ks[0], (V, H), jnp.float32)
    w_ihT = jax.random.uniform(ks[1], (L, H, 4 * H), jnp.float32, -s, s)
    w_hhT = jax.random.uniform(ks[2], (L, H, 4 * H), jnp.float32, -s, s)
    b_ih = jax.random.uniform(ks[3], (L, 1, 4 * H), jnp.float32, -s, s)
    b_hh = jax.random.uniform(ks[4], (L, 1, 4 * H), jnp.float32, -s, s)
    w_fcT = jax.random.uniform(ks[5], (H, V), jnp.float32, -s, s)
    b_fc = jax.random.uniform(ks[6], (1, V), jnp.float32, -s, s)
    return {
        "embed": embed,
        "w_ihT": w_ihT,
        "w_hhT": w_hhT,
        "b": b_ih + b_hh,
        "w_fcT": w_fcT,
        "b_fc": b_fc,
    }


if __name__ == "__main__":
    B, T = 2, 8           # batch, sequence length
    V, H, L = 16, 32, 2   # vocab, hidden size, num LSTM layers

    key = jax.random.PRNGKey(0)
    k_par, k_ids = jax.random.split(key)
    params = init_params(k_par, V, H, L)
    x = jax.random.randint(k_ids, (B, T), 0, V, dtype=jnp.int32)

    logits, (h_n, c_n) = char_lstm_forward(x, params)
    jax.block_until_ready((logits, h_n, c_n))

    assert logits.shape == (B, T, V)
    assert h_n.shape == (L, B, H) and c_n.shape == (L, B, H)
    assert bool(jnp.all(jnp.isfinite(logits)))

    # Loose numerical sanity check against a pure-JAX f32 reference
    # (kernel uses bf16 MXU operands / activations, so tolerances are generous).
    ref_logits, (ref_h, ref_c) = char_lstm_reference(x, params)
    assert float(jnp.max(jnp.abs(logits - ref_logits))) < 0.25
    assert float(jnp.max(jnp.abs(h_n - ref_h))) < 0.25
    assert float(jnp.max(jnp.abs(c_n - ref_c))) < 0.25

    print("KERNEL_OK")
</pallas_src>

<mosaic_0001>
module attributes {stable_mosaic.version = 11 : i64} {
  func.func @char_lstm_kernel(%arg0: i32, %arg1: memref<1x64x1xi32, #tpu.memory_space<vmem>>, %arg2: memref<128x32xbf16, #tpu.memory_space<vmem>>, %arg3: memref<2x32x128xbf16, #tpu.memory_space<vmem>>, %arg4: memref<2x32x128xbf16, #tpu.memory_space<vmem>>, %arg5: memref<2x1x128xf32, #tpu.memory_space<vmem>>, %arg6: memref<32x128xbf16, #tpu.memory_space<vmem>>, %arg7: memref<1x128xf32, #tpu.memory_space<vmem>>, %arg8: memref<1x64x128xbf16, #tpu.memory_space<vmem>>, %arg9: memref<2x8x32xf32, #tpu.memory_space<vmem>>, %arg10: memref<2x8x32xf32, #tpu.memory_space<vmem>>, %arg11: memref<64x32xbf16, #tpu.memory_space<vmem>>, %arg12: memref<64x128xbf16, #tpu.memory_space<vmem>>) attributes {dimension_semantics = [#tpu.dimension_semantics<parallel>], iteration_bounds = array<i64: 1>, scalar_prefetch = 0 : i64, scratch_operands = 2 : i64, tpu.core_type = #tpu.core_type<tc>, window_params = [{transform_indices = @transform_0, window_bounds = array<i64: 1, 64, 1>}, {pipeline_mode = #tpu.pipeline_mode<synchronous>, transform_indices = @transform_1, window_bounds = array<i64: 128, 32>}, {pipeline_mode = #tpu.pipeline_mode<synchronous>, transform_indices = @transform_2, window_bounds = array<i64: 2, 32, 128>}, {pipeline_mode = #tpu.pipeline_mode<synchronous>, transform_indices = @transform_3, window_bounds = array<i64: 2, 32, 128>}, {pipeline_mode = #tpu.pipeline_mode<synchronous>, transform_indices = @transform_4, window_bounds = array<i64: 2, 1, 128>}, {pipeline_mode = #tpu.pipeline_mode<synchronous>, transform_indices = @transform_5, window_bounds = array<i64: 32, 128>}, {pipeline_mode = #tpu.pipeline_mode<synchronous>, transform_indices = @transform_6, window_bounds = array<i64: 1, 128>}, {transform_indices = @transform_7, window_bounds = array<i64: 1, 64, 128>}, {transform_indices = @transform_8, window_bounds = array<i64: 2, 8, 32>}, {transform_indices = @transform_9, window_bounds = array<i64: 2, 8, 32>}]} {
    %c0 = arith.constant 0 : index
    %c0_0 = arith.constant 0 : index
    %c0_1 = arith.constant 0 : index
    %0 = vector.load %arg1[%c0, %c0_0, %c0_1] : memref<1x64x1xi32, #tpu.memory_space<vmem>>, vector<1x64x1xi32>
    %1 = vector.shape_cast %0 : vector<1x64x1xi32> to vector<64x1xi32>
    %2 = tpu.iota {dimensions = array<i32: 1>} : vector<64x128xi32>
    %3 = vector.broadcast %1 : vector<64x1xi32> to vector<64x128xi32>
    %4 = arith.cmpi eq, %2, %3 : vector<64x128xi32>
    %5 = arith.extui %4 : vector<64x128xi1> to vector<64x128xi32>
    %6 = arith.sitofp %5 : vector<64x128xi32> to vector<64x128xf32>
    %7 = arith.truncf %6 : vector<64x128xf32> to vector<64x128xbf16>
    %c0_2 = arith.constant 0 : index
    %c0_3 = arith.constant 0 : index
    %8 = vector.load %arg2[%c0_2, %c0_3] : memref<128x32xbf16, #tpu.memory_space<vmem>>, vector<128x32xbf16>
    %cst = arith.constant dense<0.000000e+00> : vector<64x32xf32>
    %9 = tpu.matmul %7, %8, %cst {dimension_numbers = #tpu.dot_dimension_numbers<[1], [0], [0], [1], [0, 0, 1, 1], [], []>} : vector<64x128xbf16>, vector<128x32xbf16>, vector<64x32xf32> -> vector<64x32xf32>
    %10 = arith.truncf %9 : vector<64x32xf32> to vector<64x32xbf16>
    %c0_4 = arith.constant 0 : index
    %c0_5 = arith.constant 0 : index
    %c0_6 = arith.constant 0 : index
    %11 = vector.load %arg3[%c0_4, %c0_5, %c0_6] : memref<2x32x128xbf16, #tpu.memory_space<vmem>>, vector<1x32x128xbf16>
    %12 = vector.shape_cast %11 : vector<1x32x128xbf16> to vector<32x128xbf16>
    %cst_7 = arith.constant dense<0.000000e+00> : vector<64x128xf32>
    %13 = tpu.matmul %10, %12, %cst_7 {dimension_numbers = #tpu.dot_dimension_numbers<[1], [0], [0], [1], [0, 0, 1, 1], [], []>} : vector<64x32xbf16>, vector<32x128xbf16>, vector<64x128xf32> -> vector<64x128xf32>
    %c0_8 = arith.constant 0 : index
    %c0_9 = arith.constant 0 : index
    %c0_10 = arith.constant 0 : index
    %14 = vector.load %arg5[%c0_8, %c0_9, %c0_10] : memref<2x1x128xf32, #tpu.memory_space<vmem>>, vector<1x1x128xf32>
    %15 = vector.shape_cast %14 : vector<1x1x128xf32> to vector<1x128xf32>
    %16 = vector.broadcast %15 : vector<1x128xf32> to vector<64x128xf32>
    %17 = arith.addf %13, %16 : vector<64x128xf32>
    %18 = arith.truncf %17 : vector<64x128xf32> to vector<64x128xbf16>
    %c0_11 = arith.constant 0 : index
    %c0_12 = arith.constant 0 : index
    %19 = vector.load %arg12[%c0_11, %c0_12] : memref<64x128xbf16, #tpu.memory_space<vmem>>, vector<64x128xbf16>
    tpu.vector_store %arg12[%c0_11, %c0_12], %18 {strides = array<i32>} : memref<64x128xbf16, #tpu.memory_space<vmem>>, vector<64x128xbf16>,
    %c0_13 = arith.constant 0 : index
    %c0_14 = arith.constant 0 : index
    %c0_15 = arith.constant 0 : index
    %20 = vector.load %arg4[%c0_13, %c0_14, %c0_15] : memref<2x32x128xbf16, #tpu.memory_space<vmem>>, vector<1x32x128xbf16>
    %21 = vector.shape_cast %20 : vector<1x32x128xbf16> to vector<32x128xbf16>
    %cst_16 = arith.constant 0.000000e+00 : bf16
    %22 = vector.broadcast %cst_16 : bf16 to vector<8x32xbf16>
    %cst_17 = arith.constant 0.000000e+00 : f32
    %23 = vector.broadcast %cst_17 : f32 to vector<8x32xf32>
    %c0_i32 = arith.constant 0 : i32
    %c8_i32 = arith.constant 8 : i32
    %24 = arith.muli %c0_i32, %c8_i32 : i32
    %25 = tpu.assume_multiple %24, 8 : i32
    %26 = arith.index_cast %25 : i32 to index
    %c0_18 = arith.constant 0 : index
    %27 = vector.load %arg12[%26, %c0_18] : memref<64x128xbf16, #tpu.memory_space<vmem>>, vector<8x128xbf16>
    %28 = arith.extf %27 : vector<8x128xbf16> to vector<8x128xf32>
    %cst_19 = arith.constant dense<0.000000e+00> : vector<8x128xf32>
    %29 = tpu.matmul %22, %21, %cst_19 {dimension_numbers = #tpu.dot_dimension_numbers<[1], [0], [0], [1], [0, 0, 1, 1], [], []>} : vector<8x32xbf16>, vector<32x128xbf16>, vector<8x128xf32> -> vector<8x128xf32>
    %30 = arith.addf %28, %29 : vector<8x128xf32>
    %31 = vector.extract_strided_slice %30 {offsets = [0, 0], sizes = [8, 96], strides = [1, 1]} : vector<8x128xf32> to vector<8x96xf32>
    %32 = arith.negf %31 : vector<8x96xf32>
    %33 = math.exp %32 : vector<8x96xf32>
    %cst_20 = arith.constant 1.000000e+00 : f32
    %34 = vector.broadcast %cst_20 : f32 to vector<8x96xf32>
    %35 = arith.addf %34, %33 : vector<8x96xf32>
    %36 = arith.divf %34, %35 : vector<8x96xf32>
    %37 = vector.extract_strided_slice %30 {offsets = [0, 96], sizes = [8, 32], strides = [1, 1]} : vector<8x128xf32> to vector<8x32xf32>
    %38 = math.tanh %37 : vector<8x32xf32>
    %39 = vector.extract_strided_slice %36 {offsets = [0, 0], sizes = [8, 32], strides = [1, 1]} : vector<8x96xf32> to vector<8x32xf32>
    %40 = vector.extract_strided_slice %36 {offsets = [0, 32], sizes = [8, 32], strides = [1, 1]} : vector<8x96xf32> to vector<8x32xf32>
    %41 = vector.extract_strided_slice %36 {offsets = [0, 64], sizes = [8, 32], strides = [1, 1]} : vector<8x96xf32> to vector<8x32xf32>
    %42 = arith.mulf %40, %23 : vector<8x32xf32>
    %43 = arith.mulf %39, %38 : vector<8x32xf32>
    %44 = arith.addf %42, %43 : vector<8x32xf32>
    %45 = math.tanh %44 : vector<8x32xf32>
    %46 = arith.mulf %41, %45 : vector<8x32xf32>
    %47 = arith.truncf %46 : vector<8x32xf32> to vector<8x32xbf16>
    %48 = arith.index_cast %25 : i32 to index
    %c0_21 = arith.constant 0 : index
    %49 = vector.load %arg11[%48, %c0_21] : memref<64x32xbf16, #tpu.memory_space<vmem>>, vector<8x32xbf16>
    tpu.vector_store %arg11[%48, %c0_21], %47 {strides = array<i32>} : memref<64x32xbf16, #tpu.memory_space<vmem>>, vector<8x32xbf16>,
    %c1_i32 = arith.constant 1 : i32
    %c8_i32_22 = arith.constant 8 : i32
    %50 = arith.muli %c1_i32, %c8_i32_22 : i32
    %51 = tpu.assume_multiple %50, 8 : i32
    %52 = arith.index_cast %51 : i32 to index
    %c0_23 = arith.constant 0 : index
    %53 = vector.load %arg12[%52, %c0_23] : memref<64x128xbf16, #tpu.memory_space<vmem>>, vector<8x128xbf16>
    %54 = arith.extf %53 : vector<8x128xbf16> to vector<8x128xf32>
    %cst_24 = arith.constant dense<0.000000e+00> : vector<8x128xf32>
    %55 = tpu.matmul %47, %21, %cst_24 {dimension_numbers = #tpu.dot_dimension_numbers<[1], [0], [0], [1], [0, 0, 1, 1], [], []>} : vector<8x32xbf16>, vector<32x128xbf16>, vector<8x128xf32> -> vector<8x128xf32>
    %56 = arith.addf %54, %55 : vector<8x128xf32>
    %57 = vector.extract_strided_slice %56 {offsets = [0, 0], sizes = [8, 96], strides = [1, 1]} : vector<8x128xf32> to vector<8x96xf32>
    %58 = arith.negf %57 : vector<8x96xf32>
    %59 = math.exp %58 : vector<8x96xf32>
    %cst_25 = arith.constant 1.000000e+00 : f32
    %60 = vector.broadcast %cst_25 : f32 to vector<8x96xf32>
    %61 = arith.addf %60, %59 : vector<8x96xf32>
    %62 = arith.divf %60, %61 : vector<8x96xf32>
    %63 = vector.extract_strided_slice %56 {offsets = [0, 96], sizes = [8, 32], strides = [1, 1]} : vector<8x128xf32> to vector<8x32xf32>
    %64 = math.tanh %63 : vector<8x32xf32>
    %65 = vector.extract_strided_slice %62 {offsets = [0, 0], sizes = [8, 32], strides = [1, 1]} : vector<8x96xf32> to vector<8x32xf32>
    %66 = vector.extract_strided_slice %62 {offsets = [0, 32], sizes = [8, 32], strides = [1, 1]} : vector<8x96xf32> to vector<8x32xf32>
    %67 = vector.extract_strided_slice %62 {offsets = [0, 64], sizes = [8, 32], strides = [1, 1]} : vector<8x96xf32> to vector<8x32xf32>
    %68 = arith.mulf %66, %44 : vector<8x32xf32>
    %69 = arith.mulf %65, %64 : vector<8x32xf32>
    %70 = arith.addf %68, %69 : vector<8x32xf32>
    %71 = math.tanh %70 : vector<8x32xf32>
    %72 = arith.mulf %67, %71 : vector<8x32xf32>
    %73 = arith.truncf %72 : vector<8x32xf32> to vector<8x32xbf16>
    %74 = arith.index_cast %51 : i32 to index
    %c0_26 = arith.constant 0 : index
    %75 = vector.load %arg11[%74, %c0_26] : memref<64x32xbf16, #tpu.memory_space<vmem>>, vector<8x32xbf16>
    tpu.vector_store %arg11[%74, %c0_26], %73 {strides = array<i32>} : memref<64x32xbf16, #tpu.memory_space<vmem>>, vector<8x32xbf16>,
    %c2_i32 = arith.constant 2 : i32
    %c8_i32_27 = arith.constant 8 : i32
    %76 = arith.muli %c2_i32, %c8_i32_27 : i32
    %77 = tpu.assume_multiple %76, 8 : i32
    %78 = arith.index_cast %77 : i32 to index
    %c0_28 = arith.constant 0 : index
    %79 = vector.load %arg12[%78, %c0_28] : memref<64x128xbf16, #tpu.memory_space<vmem>>, vector<8x128xbf16>
    %80 = arith.extf %79 : vector<8x128xbf16> to vector<8x128xf32>
    %cst_29 = arith.constant dense<0.000000e+00> : vector<8x128xf32>
    %81 = tpu.matmul %73, %21, %cst_29 {dimension_numbers = #tpu.dot_dimension_numbers<[1], [0], [0], [1], [0, 0, 1, 1], [], []>} : vector<8x32xbf16>, vector<32x128xbf16>, vector<8x128xf32> -> vector<8x128xf32>
    %82 = arith.addf %80, %81 : vector<8x128xf32>
    %83 = vector.extract_strided_slice %82 {offsets = [0, 0], sizes = [8, 96], strides = [1, 1]} : vector<8x128xf32> to vector<8x96xf32>
    %84 = arith.negf %83 : vector<8x96xf32>
    %85 = math.exp %84 : vector<8x96xf32>
    %cst_30 = arith.constant 1.000000e+00 : f32
    %86 = vector.broadcast %cst_30 : f32 to vector<8x96xf32>
    %87 = arith.addf %86, %85 : vector<8x96xf32>
    %88 = arith.divf %86, %87 : vector<8x96xf32>
    %89 = vector.extract_strided_slice %82 {offsets = [0, 96], sizes = [8, 32], strides = [1, 1]} : vector<8x128xf32> to vector<8x32xf32>
    %90 = math.tanh %89 : vector<8x32xf32>
    %91 = vector.extract_strided_slice %88 {offsets = [0, 0], sizes = [8, 32], strides = [1, 1]} : vector<8x96xf32> to vector<8x32xf32>
    %92 = vector.extract_strided_slice %88 {offsets = [0, 32], sizes = [8, 32], strides = [1, 1]} : vector<8x96xf32> to vector<8x32xf32>
    %93 = vector.extract_strided_slice %88 {offsets = [0, 64], sizes = [8, 32], strides = [1, 1]} : vector<8x96xf32> to vector<8x32xf32>
    %94 = arith.mulf %92, %70 : vector<8x32xf32>
    %95 = arith.mulf %91, %90 : vector<8x32xf32>
    %96 = arith.addf %94, %95 : vector<8x32xf32>
    %97 = math.tanh %96 : vector<8x32xf32>
    %98 = arith.mulf %93, %97 : vector<8x32xf32>
    %99 = arith.truncf %98 : vector<8x32xf32> to vector<8x32xbf16>
    %100 = arith.index_cast %77 : i32 to index
    %c0_31 = arith.constant 0 : index
    %101 = vector.load %arg11[%100, %c0_31] : memref<64x32xbf16, #tpu.memory_space<vmem>>, vector<8x32xbf16>
    tpu.vector_store %arg11[%100, %c0_31], %99 {strides = array<i32>} : memref<64x32xbf16, #tpu.memory_space<vmem>>, vector<8x32xbf16>,
    %c3_i32 = arith.constant 3 : i32
    %c8_i32_32 = arith.constant 8 : i32
    %102 = arith.muli %c3_i32, %c8_i32_32 : i32
    %103 = tpu.assume_multiple %102, 8 : i32
    %104 = arith.index_cast %103 : i32 to index
    %c0_33 = arith.constant 0 : index
    %105 = vector.load %arg12[%104, %c0_33] : memref<64x128xbf16, #tpu.memory_space<vmem>>, vector<8x128xbf16>
    %106 = arith.extf %105 : vector<8x128xbf16> to vector<8x128xf32>
    %cst_34 = arith.constant dense<0.000000e+00> : vector<8x128xf32>
    %107 = tpu.matmul %99, %21, %cst_34 {dimension_numbers = #tpu.dot_dimension_numbers<[1], [0], [0], [1], [0, 0, 1, 1], [], []>} : vector<8x32xbf16>, vector<32x128xbf16>, vector<8x128xf32> -> vector<8x128xf32>
    %108 = arith.addf %106, %107 : vector<8x128xf32>
    %109 = vector.extract_strided_slice %108 {offsets = [0, 0], sizes = [8, 96], strides = [1, 1]} : vector<8x128xf32> to vector<8x96xf32>
    %110 = arith.negf %109 : vector<8x96xf32>
    %111 = math.exp %110 : vector<8x96xf32>
    %cst_35 = arith.constant 1.000000e+00 : f32
    %112 = vector.broadcast %cst_35 : f32 to vector<8x96xf32>
    %113 = arith.addf %112, %111 : vector<8x96xf32>
    %114 = arith.divf %112, %113 : vector<8x96xf32>
    %115 = vector.extract_strided_slice %108 {offsets = [0, 96], sizes = [8, 32], strides = [1, 1]} : vector<8x128xf32> to vector<8x32xf32>
    %116 = math.tanh %115 : vector<8x32xf32>
    %117 = vector.extract_strided_slice %114 {offsets = [0, 0], sizes = [8, 32], strides = [1, 1]} : vector<8x96xf32> to vector<8x32xf32>
    %118 = vector.extract_strided_slice %114 {offsets = [0, 32], sizes = [8, 32], strides = [1, 1]} : vector<8x96xf32> to vector<8x32xf32>
    %119 = vector.extract_strided_slice %114 {offsets = [0, 64], sizes = [8, 32], strides = [1, 1]} : vector<8x96xf32> to vector<8x32xf32>
    %120 = arith.mulf %118, %96 : vector<8x32xf32>
    %121 = arith.mulf %117, %116 : vector<8x32xf32>
    %122 = arith.addf %120, %121 : vector<8x32xf32>
    %123 = math.tanh %122 : vector<8x32xf32>
    %124 = arith.mulf %119, %123 : vector<8x32xf32>
    %125 = arith.truncf %124 : vector<8x32xf32> to vector<8x32xbf16>
    %126 = arith.index_cast %103 : i32 to index
    %c0_36 = arith.constant 0 : index
    %127 = vector.load %arg11[%126, %c0_36] : memref<64x32xbf16, #tpu.memory_space<vmem>>, vector<8x32xbf16>
    tpu.vector_store %arg11[%126, %c0_36], %125 {strides = array<i32>} : memref<64x32xbf16, #tpu.memory_space<vmem>>, vector<8x32xbf16>,
    %c4_i32 = arith.constant 4 : i32
    %c8_i32_37 = arith.constant 8 : i32
    %128 = arith.muli %c4_i32, %c8_i32_37 : i32
    %129 = tpu.assume_multiple %128, 8 : i32
    %130 = arith.index_cast %129 : i32 to index
    %c0_38 = arith.constant 0 : index
    %131 = vector.load %arg12[%130, %c0_38] : memref<64x128xbf16, #tpu.memory_space<vmem>>, vector<8x128xbf16>
    %132 = arith.extf %131 : vector<8x128xbf16> to vector<8x128xf32>
    %cst_39 = arith.constant dense<0.000000e+00> : vector<8x128xf32>
    %133 = tpu.matmul %125, %21, %cst_39 {dimension_numbers = #tpu.dot_dimension_numbers<[1], [0], [0], [1], [0, 0, 1, 1], [], []>} : vector<8x32xbf16>, vector<32x128xbf16>, vector<8x128xf32> -> vector<8x128xf32>
    %134 = arith.addf %132, %133 : vector<8x128xf32>
    %135 = vector.extract_strided_slice %134 {offsets = [0, 0], sizes = [8, 96], strides = [1, 1]} : vector<8x128xf32> to vector<8x96xf32>
    %136 = arith.negf %135 : vector<8x96xf32>
    %137 = math.exp %136 : vector<8x96xf32>
    %cst_40 = arith.constant 1.000000e+00 : f32
    %138 = vector.broadcast %cst_40 : f32 to vector<8x96xf32>
    %139 = arith.addf %138, %137 : vector<8x96xf32>
    %140 = arith.divf %138, %139 : vector<8x96xf32>
    %141 = vector.extract_strided_slice %134 {offsets = [0, 96], sizes = [8, 32], strides = [1, 1]} : vector<8x128xf32> to vector<8x32xf32>
    %142 = math.tanh %141 : vector<8x32xf32>
    %143 = vector.extract_strided_slice %140 {offsets = [0, 0], sizes = [8, 32], strides = [1, 1]} : vector<8x96xf32> to vector<8x32xf32>
    %144 = vector.extract_strided_slice %140 {offsets = [0, 32], sizes = [8, 32], strides = [1, 1]} : vector<8x96xf32> to vector<8x32xf32>
    %145 = vector.extract_strided_slice %140 {offsets = [0, 64], sizes = [8, 32], strides = [1, 1]} : vector<8x96xf32> to vector<8x32xf32>
    %146 = arith.mulf %144, %122 : vector<8x32xf32>
    %147 = arith.mulf %143, %142 : vector<8x32xf32>
    %148 = arith.addf %146, %147 : vector<8x32xf32>
    %149 = math.tanh %148 : vector<8x32xf32>
    %150 = arith.mulf %145, %149 : vector<8x32xf32>
    %151 = arith.truncf %150 : vector<8x32xf32> to vector<8x32xbf16>
    %152 = arith.index_cast %129 : i32 to index
    %c0_41 = arith.constant 0 : index
    %153 = vector.load %arg11[%152, %c0_41] : memref<64x32xbf16, #tpu.memory_space<vmem>>, vector<8x32xbf16>
    tpu.vector_store %arg11[%152, %c0_41], %151 {strides = array<i32>} : memref<64x32xbf16, #tpu.memory_space<vmem>>, vector<8x32xbf16>,
    %c5_i32 = arith.constant 5 : i32
    %c8_i32_42 = arith.constant 8 : i32
    %154 = arith.muli %c5_i32, %c8_i32_42 : i32
    %155 = tpu.assume_multiple %154, 8 : i32
    %156 = arith.index_cast %155 : i32 to index
    %c0_43 = arith.constant 0 : index
    %157 = vector.load %arg12[%156, %c0_43] : memref<64x128xbf16, #tpu.memory_space<vmem>>, vector<8x128xbf16>
    %158 = arith.extf %157 : vector<8x128xbf16> to vector<8x128xf32>
    %cst_44 = arith.constant dense<0.000000e+00> : vector<8x128xf32>
    %159 = tpu.matmul %151, %21, %cst_44 {dimension_numbers = #tpu.dot_dimension_numbers<[1], [0], [0], [1], [0, 0, 1, 1], [], []>} : vector<8x32xbf16>, vector<32x128xbf16>, vector<8x128xf32> -> vector<8x128xf32>
    %160 = arith.addf %158, %159 : vector<8x128xf32>
    %161 = vector.extract_strided_slice %160 {offsets = [0, 0], sizes = [8, 96], strides = [1, 1]} : vector<8x128xf32> to vector<8x96xf32>
    %162 = arith.negf %161 : vector<8x96xf32>
    %163 = math.exp %162 : vector<8x96xf32>
    %cst_45 = arith.constant 1.000000e+00 : f32
    %164 = vector.broadcast %cst_45 : f32 to vector<8x96xf32>
    %165 = arith.addf %164, %163 : vector<8x96xf32>
    %166 = arith.divf %164, %165 : vector<8x96xf32>
    %167 = vector.extract_strided_slice %160 {offsets = [0, 96], sizes = [8, 32], strides = [1, 1]} : vector<8x128xf32> to vector<8x32xf32>
    %168 = math.tanh %167 : vector<8x32xf32>
    %169 = vector.extract_strided_slice %166 {offsets = [0, 0], sizes = [8, 32], strides = [1, 1]} : vector<8x96xf32> to vector<8x32xf32>
    %170 = vector.extract_strided_slice %166 {offsets = [0, 32], sizes = [8, 32], strides = [1, 1]} : vector<8x96xf32> to vector<8x32xf32>
    %171 = vector.extract_strided_slice %166 {offsets = [0, 64], sizes = [8, 32], strides = [1, 1]} : vector<8x96xf32> to vector<8x32xf32>
    %172 = arith.mulf %170, %148 : vector<8x32xf32>
    %173 = arith.mulf %169, %168 : vector<8x32xf32>
    %174 = arith.addf %172, %173 : vector<8x32xf32>
    %175 = math.tanh %174 : vector<8x32xf32>
    %176 = arith.mulf %171, %175 : vector<8x32xf32>
    %177 = arith.truncf %176 : vector<8x32xf32> to vector<8x32xbf16>
    %178 = arith.index_cast %155 : i32 to index
    %c0_46 = arith.constant 0 : index
    %179 = vector.load %arg11[%178, %c0_46] : memref<64x32xbf16, #tpu.memory_space<vmem>>, vector<8x32xbf16>
    tpu.vector_store %arg11[%178, %c0_46], %177 {strides = array<i32>} : memref<64x32xbf16, #tpu.memory_space<vmem>>, vector<8x32xbf16>,
    %c6_i32 = arith.constant 6 : i32
    %c8_i32_47 = arith.constant 8 : i32
    %180 = arith.muli %c6_i32, %c8_i32_47 : i32
    %181 = tpu.assume_multiple %180, 8 : i32
    %182 = arith.index_cast %181 : i32 to index
    %c0_48 = arith.constant 0 : index
    %183 = vector.load %arg12[%182, %c0_48] : memref<64x128xbf16, #tpu.memory_space<vmem>>, vector<8x128xbf16>
    %184 = arith.extf %183 : vector<8x128xbf16> to vector<8x128xf32>
    %cst_49 = arith.constant dense<0.000000e+00> : vector<8x128xf32>
    %185 = tpu.matmul %177, %21, %cst_49 {dimension_numbers = #tpu.dot_dimension_numbers<[1], [0], [0], [1], [0, 0, 1, 1], [], []>} : vector<8x32xbf16>, vector<32x128xbf16>, vector<8x128xf32> -> vector<8x128xf32>
    %186 = arith.addf %184, %185 : vector<8x128xf32>
    %187 = vector.extract_strided_slice %186 {offsets = [0, 0], sizes = [8, 96], strides = [1, 1]} : vector<8x128xf32> to vector<8x96xf32>
    %188 = arith.negf %187 : vector<8x96xf32>
    %189 = math.exp %188 : vector<8x96xf32>
    %cst_50 = arith.constant 1.000000e+00 : f32
    %190 = vector.broadcast %cst_50 : f32 to vector<8x96xf32>
    %191 = arith.addf %190, %189 : vector<8x96xf32>
    %192 = arith.divf %190, %191 : vector<8x96xf32>
    %193 = vector.extract_strided_slice %186 {offsets = [0, 96], sizes = [8, 32], strides = [1, 1]} : vector<8x128xf32> to vector<8x32xf32>
    %194 = math.tanh %193 : vector<8x32xf32>
    %195 = vector.extract_strided_slice %192 {offsets = [0, 0], sizes = [8, 32], strides = [1, 1]} : vector<8x96xf32> to vector<8x32xf32>
    %196 = vector.extract_strided_slice %192 {offsets = [0, 32], sizes = [8, 32], strides = [1, 1]} : vector<8x96xf32> to vector<8x32xf32>
    %197 = vector.extract_strided_slice %192 {offsets = [0, 64], sizes = [8, 32], strides = [1, 1]} : vector<8x96xf32> to vector<8x32xf32>
    %198 = arith.mulf %196, %174 : vector<8x32xf32>
    %199 = arith.mulf %195, %194 : vector<8x32xf32>
    %200 = arith.addf %198, %199 : vector<8x32xf32>
    %201 = math.tanh %200 : vector<8x32xf32>
    %202 = arith.mulf %197, %201 : vector<8x32xf32>
    %203 = arith.truncf %202 : vector<8x32xf32> to vector<8x32xbf16>
    %204 = arith.index_cast %181 : i32 to index
    %c0_51 = arith.constant 0 : index
    %205 = vector.load %arg11[%204, %c0_51] : memref<64x32xbf16, #tpu.memory_space<vmem>>, vector<8x32xbf16>
    tpu.vector_store %arg11[%204, %c0_51], %203 {strides = array<i32>} : memref<64x32xbf16, #tpu.memory_space<vmem>>, vector<8x32xbf16>,
    %c7_i32 = arith.constant 7 : i32
    %c8_i32_52 = arith.constant 8 : i32
    %206 = arith.muli %c7_i32, %c8_i32_52 : i32
    %207 = tpu.assume_multiple %206, 8 : i32
    %208 = arith.index_cast %207 : i32 to index
    %c0_53 = arith.constant 0 : index
    %209 = vector.load %arg12[%208, %c0_53] : memref<64x128xbf16, #tpu.memory_space<vmem>>, vector<8x128xbf16>
    %210 = arith.extf %209 : vector<8x128xbf16> to vector<8x128xf32>
    %cst_54 = arith.constant dense<0.000000e+00> : vector<8x128xf32>
    %211 = tpu.matmul %203, %21, %cst_54 {dimension_numbers = #tpu.dot_dimension_numbers<[1], [0], [0], [1], [0, 0, 1, 1], [], []>} : vector<8x32xbf16>, vector<32x128xbf16>, vector<8x128xf32> -> vector<8x128xf32>
    %212 = arith.addf %210, %211 : vector<8x128xf32>
    %213 = vector.extract_strided_slice %212 {offsets = [0, 0], sizes = [8, 96], strides = [1, 1]} : vector<8x128xf32> to vector<8x96xf32>
    %214 = arith.negf %213 : vector<8x96xf32>
    %215 = math.exp %214 : vector<8x96xf32>
    %cst_55 = arith.constant 1.000000e+00 : f32
    %216 = vector.broadcast %cst_55 : f32 to vector<8x96xf32>
    %217 = arith.addf %216, %215 : vector<8x96xf32>
    %218 = arith.divf %216, %217 : vector<8x96xf32>
    %219 = vector.extract_strided_slice %212 {offsets = [0, 96], sizes = [8, 32], strides = [1, 1]} : vector<8x128xf32> to vector<8x32xf32>
    %220 = math.tanh %219 : vector<8x32xf32>
    %221 = vector.extract_strided_slice %218 {offsets = [0, 0], sizes = [8, 32], strides = [1, 1]} : vector<8x96xf32> to vector<8x32xf32>
    %222 = vector.extract_strided_slice %218 {offsets = [0, 32], sizes = [8, 32], strides = [1, 1]} : vector<8x96xf32> to vector<8x32xf32>
    %223 = vector.extract_strided_slice %218 {offsets = [0, 64], sizes = [8, 32], strides = [1, 1]} : vector<8x96xf32> to vector<8x32xf32>
    %224 = arith.mulf %222, %200 : vector<8x32xf32>
    %225 = arith.mulf %221, %220 : vector<8x32xf32>
    %226 = arith.addf %224, %225 : vector<8x32xf32>
    %227 = math.tanh %226 : vector<8x32xf32>
    %228 = arith.mulf %223, %227 : vector<8x32xf32>
    %229 = arith.truncf %228 : vector<8x32xf32> to vector<8x32xbf16>
    %230 = arith.index_cast %207 : i32 to index
    %c0_56 = arith.constant 0 : index
    %231 = vector.load %arg11[%230, %c0_56] : memref<64x32xbf16, #tpu.memory_space<vmem>>, vector<8x32xbf16>
    tpu.vector_store %arg11[%230, %c0_56], %229 {strides = array<i32>} : memref<64x32xbf16, #tpu.memory_space<vmem>>, vector<8x32xbf16>,
    %c8_i32_57 = arith.constant 8 : i32
    %232 = arith.extf %229 : vector<8x32xbf16> to vector<8x32xf32>
    %c0_58 = arith.constant 0 : index
    %c0_59 = arith.constant 0 : index
    %c0_60 = arith.constant 0 : index
    %233 = vector.load %arg9[%c0_58, %c0_59, %c0_60] : memref<2x8x32xf32, #tpu.memory_space<vmem>>, vector<1x8x32xf32>
    %234 = vector.shape_cast %233 : vector<1x8x32xf32> to vector<8x32xf32>
    %235 = vector.shape_cast %232 : vector<8x32xf32> to vector<1x8x32xf32>
    tpu.vector_store %arg9[%c0_58, %c0_59, %c0_60], %235 {strides = array<i32>} : memref<2x8x32xf32, #tpu.memory_space<vmem>>, vector<1x8x32xf32>,
    %c0_61 = arith.constant 0 : index
    %c0_62 = arith.constant 0 : index
    %c0_63 = arith.constant 0 : index
    %236 = vector.load %arg10[%c0_61, %c0_62, %c0_63] : memref<2x8x32xf32, #tpu.memory_space<vmem>>, vector<1x8x32xf32>
    %237 = vector.shape_cast %236 : vector<1x8x32xf32> to vector<8x32xf32>
    %238 = vector.shape_cast %226 : vector<8x32xf32> to vector<1x8x32xf32>
    tpu.vector_store %arg10[%c0_61, %c0_62, %c0_63], %238 {strides = array<i32>} : memref<2x8x32xf32, #tpu.memory_space<vmem>>, vector<1x8x32xf32>,
    %c0_64 = arith.constant 0 : index
    %c0_65 = arith.constant 0 : index
    %239 = vector.load %arg11[%c0_64, %c0_65] : memref<64x32xbf16, #tpu.memory_space<vmem>>, vector<64x32xbf16>
    %c1 = arith.constant 1 : index
    %c0_66 = arith.constant 0 : index
    %c0_67 = arith.constant 0 : index
    %240 = vector.load %arg3[%c1, %c0_66, %c0_67] : memref<2x32x128xbf16, #tpu.memory_space<vmem>>, vector<1x32x128xbf16>
    %241 = vector.shape_cast %240 : vector<1x32x128xbf16> to vector<32x128xbf16>
    %cst_68 = arith.constant dense<0.000000e+00> : vector<64x128xf32>
    %242 = tpu.matmul %239, %241, %cst_68 {dimension_numbers = #tpu.dot_dimension_numbers<[1], [0], [0], [1], [0, 0, 1, 1], [], []>} : vector<64x32xbf16>, vector<32x128xbf16>, vector<64x128xf32> -> vector<64x128xf32>
    %c1_69 = arith.constant 1 : index
    %c0_70 = arith.constant 0 : index
    %c0_71 = arith.constant 0 : index
    %243 = vector.load %arg5[%c1_69, %c0_70, %c0_71] : memref<2x1x128xf32, #tpu.memory_space<vmem>>, vector<1x1x128xf32>
    %244 = vector.shape_cast %243 : vector<1x1x128xf32> to vector<1x128xf32>
    %245 = vector.broadcast %244 : vector<1x128xf32> to vector<64x128xf32>
    %246 = arith.addf %242, %245 : vector<64x128xf32>
    %247 = arith.truncf %246 : vector<64x128xf32> to vector<64x128xbf16>
    %c0_72 = arith.constant 0 : index
    %c0_73 = arith.constant 0 : index
    %248 = vector.load %arg12[%c0_72, %c0_73] : memref<64x128xbf16, #tpu.memory_space<vmem>>, vector<64x128xbf16>
    tpu.vector_store %arg12[%c0_72, %c0_73], %247 {strides = array<i32>} : memref<64x128xbf16, #tpu.memory_space<vmem>>, vector<64x128xbf16>,
    %c1_74 = arith.constant 1 : index
    %c0_75 = arith.constant 0 : index
    %c0_76 = arith.constant 0 : index
    %249 = vector.load %arg4[%c1_74, %c0_75, %c0_76] : memref<2x32x128xbf16, #tpu.memory_space<vmem>>, vector<1x32x128xbf16>
    %250 = vector.shape_cast %249 : vector<1x32x128xbf16> to vector<32x128xbf16>
    %cst_77 = arith.constant 0.000000e+00 : bf16
    %251 = vector.broadcast %cst_77 : bf16 to vector<8x32xbf16>
    %cst_78 = arith.constant 0.000000e+00 : f32
    %252 = vector.broadcast %cst_78 : f32 to vector<8x32xf32>
    %c0_i32_79 = arith.constant 0 : i32
    %c8_i32_80 = arith.constant 8 : i32
    %253 = arith.muli %c0_i32_79, %c8_i32_80 : i32
    %254 = tpu.assume_multiple %253, 8 : i32
    %255 = arith.index_cast %254 : i32 to index
    %c0_81 = arith.constant 0 : index
    %256 = vector.load %arg12[%255, %c0_81] : memref<64x128xbf16, #tpu.memory_space<vmem>>, vector<8x128xbf16>
    %257 = arith.extf %256 : vector<8x128xbf16> to vector<8x128xf32>
    %cst_82 = arith.constant dense<0.000000e+00> : vector<8x128xf32>
    %258 = tpu.matmul %251, %250, %cst_82 {dimension_numbers = #tpu.dot_dimension_numbers<[1], [0], [0], [1], [0, 0, 1, 1], [], []>} : vector<8x32xbf16>, vector<32x128xbf16>, vector<8x128xf32> -> vector<8x128xf32>
    %259 = arith.addf %257, %258 : vector<8x128xf32>
    %260 = vector.extract_strided_slice %259 {offsets = [0, 0], sizes = [8, 96], strides = [1, 1]} : vector<8x128xf32> to vector<8x96xf32>
    %261 = arith.negf %260 : vector<8x96xf32>
    %262 = math.exp %261 : vector<8x96xf32>
    %cst_83 = arith.constant 1.000000e+00 : f32
    %263 = vector.broadcast %cst_83 : f32 to vector<8x96xf32>
    %264 = arith.addf %263, %262 : vector<8x96xf32>
    %265 = arith.divf %263, %264 : vector<8x96xf32>
    %266 = vector.extract_strided_slice %259 {offsets = [0, 96], sizes = [8, 32], strides = [1, 1]} : vector<8x128xf32> to vector<8x32xf32>
    %267 = math.tanh %266 : vector<8x32xf32>
    %268 = vector.extract_strided_slice %265 {offsets = [0, 0], sizes = [8, 32], strides = [1, 1]} : vector<8x96xf32> to vector<8x32xf32>
    %269 = vector.extract_strided_slice %265 {offsets = [0, 32], sizes = [8, 32], strides = [1, 1]} : vector<8x96xf32> to vector<8x32xf32>
    %270 = vector.extract_strided_slice %265 {offsets = [0, 64], sizes = [8, 32], strides = [1, 1]} : vector<8x96xf32> to vector<8x32xf32>
    %271 = arith.mulf %269, %252 : vector<8x32xf32>
    %272 = arith.mulf %268, %267 : vector<8x32xf32>
    %273 = arith.addf %271, %272 : vector<8x32xf32>
    %274 = math.tanh %273 : vector<8x32xf32>
    %275 = arith.mulf %270, %274 : vector<8x32xf32>
    %276 = arith.truncf %275 : vector<8x32xf32> to vector<8x32xbf16>
    %277 = arith.index_cast %254 : i32 to index
    %c0_84 = arith.constant 0 : index
    %278 = vector.load %arg11[%277, %c0_84] : memref<64x32xbf16, #tpu.memory_space<vmem>>, vector<8x32xbf16>
    tpu.vector_store %arg11[%277, %c0_84], %276 {strides = array<i32>} : memref<64x32xbf16, #tpu.memory_space<vmem>>, vector<8x32xbf16>,
    %c1_i32_85 = arith.constant 1 : i32
    %c8_i32_86 = arith.constant 8 : i32
    %279 = arith.muli %c1_i32_85, %c8_i32_86 : i32
    %280 = tpu.assume_multiple %279, 8 : i32
    %281 = arith.index_cast %280 : i32 to index
    %c0_87 = arith.constant 0 : index
    %282 = vector.load %arg12[%281, %c0_87] : memref<64x128xbf16, #tpu.memory_space<vmem>>, vector<8x128xbf16>
    %283 = arith.extf %282 : vector<8x128xbf16> to vector<8x128xf32>
    %cst_88 = arith.constant dense<0.000000e+00> : vector<8x128xf32>
    %284 = tpu.matmul %276, %250, %cst_88 {dimension_numbers = #tpu.dot_dimension_numbers<[1], [0], [0], [1], [0, 0, 1, 1], [], []>} : vector<8x32xbf16>, vector<32x128xbf16>, vector<8x128xf32> -> vector<8x128xf32>
    %285 = arith.addf %283, %284 : vector<8x128xf32>
    %286 = vector.extract_strided_slice %285 {offsets = [0, 0], sizes = [8, 96], strides = [1, 1]} : vector<8x128xf32> to vector<8x96xf32>
    %287 = arith.negf %286 : vector<8x96xf32>
    %288 = math.exp %287 : vector<8x96xf32>
    %cst_89 = arith.constant 1.000000e+00 : f32
    %289 = vector.broadcast %cst_89 : f32 to vector<8x96xf32>
    %290 = arith.addf %289, %288 : vector<8x96xf32>
    %291 = arith.divf %289, %290 : vector<8x96xf32>
    %292 = vector.extract_strided_slice %285 {offsets = [0, 96], sizes = [8, 32], strides = [1, 1]} : vector<8x128xf32> to vector<8x32xf32>
    %293 = math.tanh %292 : vector<8x32xf32>
    %294 = vector.extract_strided_slice %291 {offsets = [0, 0], sizes = [8, 32], strides = [1, 1]} : vector<8x96xf32> to vector<8x32xf32>
    %295 = vector.extract_strided_slice %291 {offsets = [0, 32], sizes = [8, 32], strides = [1, 1]} : vector<8x96xf32> to vector<8x32xf32>
    %296 = vector.extract_strided_slice %291 {offsets = [0, 64], sizes = [8, 32], strides = [1, 1]} : vector<8x96xf32> to vector<8x32xf32>
    %297 = arith.mulf %295, %273 : vector<8x32xf32>
    %298 = arith.mulf %294, %293 : vector<8x32xf32>
    %299 = arith.addf %297, %298 : vector<8x32xf32>
    %300 = math.tanh %299 : vector<8x32xf32>
    %301 = arith.mulf %296, %300 : vector<8x32xf32>
    %302 = arith.truncf %301 : vector<8x32xf32> to vector<8x32xbf16>
    %303 = arith.index_cast %280 : i32 to index
    %c0_90 = arith.constant 0 : index
    %304 = vector.load %arg11[%303, %c0_90] : memref<64x32xbf16, #tpu.memory_space<vmem>>, vector<8x32xbf16>
    tpu.vector_store %arg11[%303, %c0_90], %302 {strides = array<i32>} : memref<64x32xbf16, #tpu.memory_space<vmem>>, vector<8x32xbf16>,
    %c2_i32_91 = arith.constant 2 : i32
    %c8_i32_92 = arith.constant 8 : i32
    %305 = arith.muli %c2_i32_91, %c8_i32_92 : i32
    %306 = tpu.assume_multiple %305, 8 : i32
    %307 = arith.index_cast %306 : i32 to index
    %c0_93 = arith.constant 0 : index
    %308 = vector.load %arg12[%307, %c0_93] : memref<64x128xbf16, #tpu.memory_space<vmem>>, vector<8x128xbf16>
    %309 = arith.extf %308 : vector<8x128xbf16> to vector<8x128xf32>
    %cst_94 = arith.constant dense<0.000000e+00> : vector<8x128xf32>
    %310 = tpu.matmul %302, %250, %cst_94 {dimension_numbers = #tpu.dot_dimension_numbers<[1], [0], [0], [1], [0, 0, 1, 1], [], []>} : vector<8x32xbf16>, vector<32x128xbf16>, vector<8x128xf32> -> vector<8x128xf32>
    %311 = arith.addf %309, %310 : vector<8x128xf32>
    %312 = vector.extract_strided_slice %311 {offsets = [0, 0], sizes = [8, 96], strides = [1, 1]} : vector<8x128xf32> to vector<8x96xf32>
    %313 = arith.negf %312 : vector<8x96xf32>
    %314 = math.exp %313 : vector<8x96xf32>
    %cst_95 = arith.constant 1.000000e+00 : f32
    %315 = vector.broadcast %cst_95 : f32 to vector<8x96xf32>
    %316 = arith.addf %315, %314 : vector<8x96xf32>
    %317 = arith.divf %315, %316 : vector<8x96xf32>
    %318 = vector.extract_strided_slice %311 {offsets = [0, 96], sizes = [8, 32], strides = [1, 1]} : vector<8x128xf32> to vector<8x32xf32>
    %319 = math.tanh %318 : vector<8x32xf32>
    %320 = vector.extract_strided_slice %317 {offsets = [0, 0], sizes = [8, 32], strides = [1, 1]} : vector<8x96xf32> to vector<8x32xf32>
    %321 = vector.extract_strided_slice %317 {offsets = [0, 32], sizes = [8, 32], strides = [1, 1]} : vector<8x96xf32> to vector<8x32xf32>
    %322 = vector.extract_strided_slice %317 {offsets = [0, 64], sizes = [8, 32], strides = [1, 1]} : vector<8x96xf32> to vector<8x32xf32>
    %323 = arith.mulf %321, %299 : vector<8x32xf32>
    %324 = arith.mulf %320, %319 : vector<8x32xf32>
    %325 = arith.addf %323, %324 : vector<8x32xf32>
    %326 = math.tanh %325 : vector<8x32xf32>
    %327 = arith.mulf %322, %326 : vector<8x32xf32>
    %328 = arith.truncf %327 : vector<8x32xf32> to vector<8x32xbf16>
    %329 = arith.index_cast %306 : i32 to index
    %c0_96 = arith.constant 0 : index
    %330 = vector.load %arg11[%329, %c0_96] : memref<64x32xbf16, #tpu.memory_space<vmem>>, vector<8x32xbf16>
    tpu.vector_store %arg11[%329, %c0_96], %328 {strides = array<i32>} : memref<64x32xbf16, #tpu.memory_space<vmem>>, vector<8x32xbf16>,
    %c3_i32_97 = arith.constant 3 : i32
    %c8_i32_98 = arith.constant 8 : i32
    %331 = arith.muli %c3_i32_97, %c8_i32_98 : i32
    %332 = tpu.assume_multiple %331, 8 : i32
    %333 = arith.index_cast %332 : i32 to index
    %c0_99 = arith.constant 0 : index
    %334 = vector.load %arg12[%333, %c0_99] : memref<64x128xbf16, #tpu.memory_space<vmem>>, vector<8x128xbf16>
    %335 = arith.extf %334 : vector<8x128xbf16> to vector<8x128xf32>
    %cst_100 = arith.constant dense<0.000000e+00> : vector<8x128xf32>
    %336 = tpu.matmul %328, %250, %cst_100 {dimension_numbers = #tpu.dot_dimension_numbers<[1], [0], [0], [1], [0, 0, 1, 1], [], []>} : vector<8x32xbf16>, vector<32x128xbf16>, vector<8x128xf32> -> vector<8x128xf32>
    %337 = arith.addf %335, %336 : vector<8x128xf32>
    %338 = vector.extract_strided_slice %337 {offsets = [0, 0], sizes = [8, 96], strides = [1, 1]} : vector<8x128xf32> to vector<8x96xf32>
    %339 = arith.negf %338 : vector<8x96xf32>
    %340 = math.exp %339 : vector<8x96xf32>
    %cst_101 = arith.constant 1.000000e+00 : f32
    %341 = vector.broadcast %cst_101 : f32 to vector<8x96xf32>
    %342 = arith.addf %341, %340 : vector<8x96xf32>
    %343 = arith.divf %341, %342 : vector<8x96xf32>
    %344 = vector.extract_strided_slice %337 {offsets = [0, 96], sizes = [8, 32], strides = [1, 1]} : vector<8x128xf32> to vector<8x32xf32>
    %345 = math.tanh %344 : vector<8x32xf32>
    %346 = vector.extract_strided_slice %343 {offsets = [0, 0], sizes = [8, 32], strides = [1, 1]} : vector<8x96xf32> to vector<8x32xf32>
    %347 = vector.extract_strided_slice %343 {offsets = [0, 32], sizes = [8, 32], strides = [1, 1]} : vector<8x96xf32> to vector<8x32xf32>
    %348 = vector.extract_strided_slice %343 {offsets = [0, 64], sizes = [8, 32], strides = [1, 1]} : vector<8x96xf32> to vector<8x32xf32>
    %349 = arith.mulf %347, %325 : vector<8x32xf32>
    %350 = arith.mulf %346, %345 : vector<8x32xf32>
    %351 = arith.addf %349, %350 : vector<8x32xf32>
    %352 = math.tanh %351 : vector<8x32xf32>
    %353 = arith.mulf %348, %352 : vector<8x32xf32>
    %354 = arith.truncf %353 : vector<8x32xf32> to vector<8x32xbf16>
    %355 = arith.index_cast %332 : i32 to index
    %c0_102 = arith.constant 0 : index
    %356 = vector.load %arg11[%355, %c0_102] : memref<64x32xbf16, #tpu.memory_space<vmem>>, vector<8x32xbf16>
    tpu.vector_store %arg11[%355, %c0_102], %354 {strides = array<i32>} : memref<64x32xbf16, #tpu.memory_space<vmem>>, vector<8x32xbf16>,
    %c4_i32_103 = arith.constant 4 : i32
    %c8_i32_104 = arith.constant 8 : i32
    %357 = arith.muli %c4_i32_103, %c8_i32_104 : i32
    %358 = tpu.assume_multiple %357, 8 : i32
    %359 = arith.index_cast %358 : i32 to index
    %c0_105 = arith.constant 0 : index
    %360 = vector.load %arg12[%359, %c0_105] : memref<64x128xbf16, #tpu.memory_space<vmem>>, vector<8x128xbf16>
    %361 = arith.extf %360 : vector<8x128xbf16> to vector<8x128xf32>
    %cst_106 = arith.constant dense<0.000000e+00> : vector<8x128xf32>
    %362 = tpu.matmul %354, %250, %cst_106 {dimension_numbers = #tpu.dot_dimension_numbers<[1], [0], [0], [1], [0, 0, 1, 1], [], []>} : vector<8x32xbf16>, vector<32x128xbf16>, vector<8x128xf32> -> vector<8x128xf32>
    %363 = arith.addf %361, %362 : vector<8x128xf32>
    %364 = vector.extract_strided_slice %363 {offsets = [0, 0], sizes = [8, 96], strides = [1, 1]} : vector<8x128xf32> to vector<8x96xf32>
    %365 = arith.negf %364 : vector<8x96xf32>
    %366 = math.exp %365 : vector<8x96xf32>
    %cst_107 = arith.constant 1.000000e+00 : f32
    %367 = vector.broadcast %cst_107 : f32 to vector<8x96xf32>
    %368 = arith.addf %367, %366 : vector<8x96xf32>
    %369 = arith.divf %367, %368 : vector<8x96xf32>
    %370 = vector.extract_strided_slice %363 {offsets = [0, 96], sizes = [8, 32], strides = [1, 1]} : vector<8x128xf32> to vector<8x32xf32>
    %371 = math.tanh %370 : vector<8x32xf32>
    %372 = vector.extract_strided_slice %369 {offsets = [0, 0], sizes = [8, 32], strides = [1, 1]} : vector<8x96xf32> to vector<8x32xf32>
    %373 = vector.extract_strided_slice %369 {offsets = [0, 32], sizes = [8, 32], strides = [1, 1]} : vector<8x96xf32> to vector<8x32xf32>
    %374 = vector.extract_strided_slice %369 {offsets = [0, 64], sizes = [8, 32], strides = [1, 1]} : vector<8x96xf32> to vector<8x32xf32>
    %375 = arith.mulf %373, %351 : vector<8x32xf32>
    %376 = arith.mulf %372, %371 : vector<8x32xf32>
    %377 = arith.addf %375, %376 : vector<8x32xf32>
    %378 = math.tanh %377 : vector<8x32xf32>
    %379 = arith.mulf %374, %378 : vector<8x32xf32>
    %380 = arith.truncf %379 : vector<8x32xf32> to vector<8x32xbf16>
    %381 = arith.index_cast %358 : i32 to index
    %c0_108 = arith.constant 0 : index
    %382 = vector.load %arg11[%381, %c0_108] : memref<64x32xbf16, #tpu.memory_space<vmem>>, vector<8x32xbf16>
    tpu.vector_store %arg11[%381, %c0_108], %380 {strides = array<i32>} : memref<64x32xbf16, #tpu.memory_space<vmem>>, vector<8x32xbf16>,
    %c5_i32_109 = arith.constant 5 : i32
    %c8_i32_110 = arith.constant 8 : i32
    %383 = arith.muli %c5_i32_109, %c8_i32_110 : i32
    %384 = tpu.assume_multiple %383, 8 : i32
    %385 = arith.index_cast %384 : i32 to index
    %c0_111 = arith.constant 0 : index
    %386 = vector.load %arg12[%385, %c0_111] : memref<64x128xbf16, #tpu.memory_space<vmem>>, vector<8x128xbf16>
    %387 = arith.extf %386 : vector<8x128xbf16> to vector<8x128xf32>
    %cst_112 = arith.constant dense<0.000000e+00> : vector<8x128xf32>
    %388 = tpu.matmul %380, %250, %cst_112 {dimension_numbers = #tpu.dot_dimension_numbers<[1], [0], [0], [1], [0, 0, 1, 1], [], []>} : vector<8x32xbf16>, vector<32x128xbf16>, vector<8x128xf32> -> vector<8x128xf32>
    %389 = arith.addf %387, %388 : vector<8x128xf32>
    %390 = vector.extract_strided_slice %389 {offsets = [0, 0], sizes = [8, 96], strides = [1, 1]} : vector<8x128xf32> to vector<8x96xf32>
    %391 = arith.negf %390 : vector<8x96xf32>
    %392 = math.exp %391 : vector<8x96xf32>
    %cst_113 = arith.constant 1.000000e+00 : f32
    %393 = vector.broadcast %cst_113 : f32 to vector<8x96xf32>
    %394 = arith.addf %393, %392 : vector<8x96xf32>
    %395 = arith.divf %393, %394 : vector<8x96xf32>
    %396 = vector.extract_strided_slice %389 {offsets = [0, 96], sizes = [8, 32], strides = [1, 1]} : vector<8x128xf32> to vector<8x32xf32>
    %397 = math.tanh %396 : vector<8x32xf32>
    %398 = vector.extract_strided_slice %395 {offsets = [0, 0], sizes = [8, 32], strides = [1, 1]} : vector<8x96xf32> to vector<8x32xf32>
    %399 = vector.extract_strided_slice %395 {offsets = [0, 32], sizes = [8, 32], strides = [1, 1]} : vector<8x96xf32> to vector<8x32xf32>
    %400 = vector.extract_strided_slice %395 {offsets = [0, 64], sizes = [8, 32], strides = [1, 1]} : vector<8x96xf32> to vector<8x32xf32>
    %401 = arith.mulf %399, %377 : vector<8x32xf32>
    %402 = arith.mulf %398, %397 : vector<8x32xf32>
    %403 = arith.addf %401, %402 : vector<8x32xf32>
    %404 = math.tanh %403 : vector<8x32xf32>
    %405 = arith.mulf %400, %404 : vector<8x32xf32>
    %406 = arith.truncf %405 : vector<8x32xf32> to vector<8x32xbf16>
    %407 = arith.index_cast %384 : i32 to index
    %c0_114 = arith.constant 0 : index
    %408 = vector.load %arg11[%407, %c0_114] : memref<64x32xbf16, #tpu.memory_space<vmem>>, vector<8x32xbf16>
    tpu.vector_store %arg11[%407, %c0_114], %406 {strides = array<i32>} : memref<64x32xbf16, #tpu.memory_space<vmem>>, vector<8x32xbf16>,
    %c6_i32_115 = arith.constant 6 : i32
    %c8_i32_116 = arith.constant 8 : i32
    %409 = arith.muli %c6_i32_115, %c8_i32_116 : i32
    %410 = tpu.assume_multiple %409, 8 : i32
    %411 = arith.index_cast %410 : i32 to index
    %c0_117 = arith.constant 0 : index
    %412 = vector.load %arg12[%411, %c0_117] : memref<64x128xbf16, #tpu.memory_space<vmem>>, vector<8x128xbf16>
    %413 = arith.extf %412 : vector<8x128xbf16> to vector<8x128xf32>
    %cst_118 = arith.constant dense<0.000000e+00> : vector<8x128xf32>
    %414 = tpu.matmul %406, %250, %cst_118 {dimension_numbers = #tpu.dot_dimension_numbers<[1], [0], [0], [1], [0, 0, 1, 1], [], []>} : vector<8x32xbf16>, vector<32x128xbf16>, vector<8x128xf32> -> vector<8x128xf32>
    %415 = arith.addf %413, %414 : vector<8x128xf32>
    %416 = vector.extract_strided_slice %415 {offsets = [0, 0], sizes = [8, 96], strides = [1, 1]} : vector<8x128xf32> to vector<8x96xf32>
    %417 = arith.negf %416 : vector<8x96xf32>
    %418 = math.exp %417 : vector<8x96xf32>
    %cst_119 = arith.constant 1.000000e+00 : f32
    %419 = vector.broadcast %cst_119 : f32 to vector<8x96xf32>
    %420 = arith.addf %419, %418 : vector<8x96xf32>
    %421 = arith.divf %419, %420 : vector<8x96xf32>
    %422 = vector.extract_strided_slice %415 {offsets = [0, 96], sizes = [8, 32], strides = [1, 1]} : vector<8x128xf32> to vector<8x32xf32>
    %423 = math.tanh %422 : vector<8x32xf32>
    %424 = vector.extract_strided_slice %421 {offsets = [0, 0], sizes = [8, 32], strides = [1, 1]} : vector<8x96xf32> to vector<8x32xf32>
    %425 = vector.extract_strided_slice %421 {offsets = [0, 32], sizes = [8, 32], strides = [1, 1]} : vector<8x96xf32> to vector<8x32xf32>
    %426 = vector.extract_strided_slice %421 {offsets = [0, 64], sizes = [8, 32], strides = [1, 1]} : vector<8x96xf32> to vector<8x32xf32>
    %427 = arith.mulf %425, %403 : vector<8x32xf32>
    %428 = arith.mulf %424, %423 : vector<8x32xf32>
    %429 = arith.addf %427, %428 : vector<8x32xf32>
    %430 = math.tanh %429 : vector<8x32xf32>
    %431 = arith.mulf %426, %430 : vector<8x32xf32>
    %432 = arith.truncf %431 : vector<8x32xf32> to vector<8x32xbf16>
    %433 = arith.index_cast %410 : i32 to index
    %c0_120 = arith.constant 0 : index
    %434 = vector.load %arg11[%433, %c0_120] : memref<64x32xbf16, #tpu.memory_space<vmem>>, vector<8x32xbf16>
    tpu.vector_store %arg11[%433, %c0_120], %432 {strides = array<i32>} : memref<64x32xbf16, #tpu.memory_space<vmem>>, vector<8x32xbf16>,
    %c7_i32_121 = arith.constant 7 : i32
    %c8_i32_122 = arith.constant 8 : i32
    %435 = arith.muli %c7_i32_121, %c8_i32_122 : i32
    %436 = tpu.assume_multiple %435, 8 : i32
    %437 = arith.index_cast %436 : i32 to index
    %c0_123 = arith.constant 0 : index
    %438 = vector.load %arg12[%437, %c0_123] : memref<64x128xbf16, #tpu.memory_space<vmem>>, vector<8x128xbf16>
    %439 = arith.extf %438 : vector<8x128xbf16> to vector<8x128xf32>
    %cst_124 = arith.constant dense<0.000000e+00> : vector<8x128xf32>
    %440 = tpu.matmul %432, %250, %cst_124 {dimension_numbers = #tpu.dot_dimension_numbers<[1], [0], [0], [1], [0, 0, 1, 1], [], []>} : vector<8x32xbf16>, vector<32x128xbf16>, vector<8x128xf32> -> vector<8x128xf32>
    %441 = arith.addf %439, %440 : vector<8x128xf32>
    %442 = vector.extract_strided_slice %441 {offsets = [0, 0], sizes = [8, 96], strides = [1, 1]} : vector<8x128xf32> to vector<8x96xf32>
    %443 = arith.negf %442 : vector<8x96xf32>
    %444 = math.exp %443 : vector<8x96xf32>
    %cst_125 = arith.constant 1.000000e+00 : f32
    %445 = vector.broadcast %cst_125 : f32 to vector<8x96xf32>
    %446 = arith.addf %445, %444 : vector<8x96xf32>
    %447 = arith.divf %445, %446 : vector<8x96xf32>
    %448 = vector.extract_strided_slice %441 {offsets = [0, 96], sizes = [8, 32], strides = [1, 1]} : vector<8x128xf32> to vector<8x32xf32>
    %449 = math.tanh %448 : vector<8x32xf32>
    %450 = vector.extract_strided_slice %447 {offsets = [0, 0], sizes = [8, 32], strides = [1, 1]} : vector<8x96xf32> to vector<8x32xf32>
    %451 = vector.extract_strided_slice %447 {offsets = [0, 32], sizes = [8, 32], strides = [1, 1]} : vector<8x96xf32> to vector<8x32xf32>
    %452 = vector.extract_strided_slice %447 {offsets = [0, 64], sizes = [8, 32], strides = [1, 1]} : vector<8x96xf32> to vector<8x32xf32>
    %453 = arith.mulf %451, %429 : vector<8x32xf32>
    %454 = arith.mulf %450, %449 : vector<8x32xf32>
    %455 = arith.addf %453, %454 : vector<8x32xf32>
    %456 = math.tanh %455 : vector<8x32xf32>
    %457 = arith.mulf %452, %456 : vector<8x32xf32>
    %458 = arith.truncf %457 : vector<8x32xf32> to vector<8x32xbf16>
    %459 = arith.index_cast %436 : i32 to index
    %c0_126 = arith.constant 0 : index
    %460 = vector.load %arg11[%459, %c0_126] : memref<64x32xbf16, #tpu.memory_space<vmem>>, vector<8x32xbf16>
    tpu.vector_store %arg11[%459, %c0_126], %458 {strides = array<i32>} : memref<64x32xbf16, #tpu.memory_space<vmem>>, vector<8x32xbf16>,
    %c8_i32_127 = arith.constant 8 : i32
    %461 = arith.extf %458 : vector<8x32xbf16> to vector<8x32xf32>
    %c1_128 = arith.constant 1 : index
    %c0_129 = arith.constant 0 : index
    %c0_130 = arith.constant 0 : index
    %462 = vector.load %arg9[%c1_128, %c0_129, %c0_130] : memref<2x8x32xf32, #tpu.memory_space<vmem>>, vector<1x8x32xf32>
    %463 = vector.shape_cast %462 : vector<1x8x32xf32> to vector<8x32xf32>
    %464 = vector.shape_cast %461 : vector<8x32xf32> to vector<1x8x32xf32>
    tpu.vector_store %arg9[%c1_128, %c0_129, %c0_130], %464 {strides = array<i32>} : memref<2x8x32xf32, #tpu.memory_space<vmem>>, vector<1x8x32xf32>,
    %c1_131 = arith.constant 1 : index
    %c0_132 = arith.constant 0 : index
    %c0_133 = arith.constant 0 : index
    %465 = vector.load %arg10[%c1_131, %c0_132, %c0_133] : memref<2x8x32xf32, #tpu.memory_space<vmem>>, vector<1x8x32xf32>
    %466 = vector.shape_cast %465 : vector<1x8x32xf32> to vector<8x32xf32>
    %467 = vector.shape_cast %455 : vector<8x32xf32> to vector<1x8x32xf32>
    tpu.vector_store %arg10[%c1_131, %c0_132, %c0_133], %467 {strides = array<i32>} : memref<2x8x32xf32, #tpu.memory_space<vmem>>, vector<1x8x32xf32>,
    %c0_134 = arith.constant 0 : index
    %c0_135 = arith.constant 0 : index
    %468 = vector.load %arg11[%c0_134, %c0_135] : memref<64x32xbf16, #tpu.memory_space<vmem>>, vector<64x32xbf16>
    %c0_136 = arith.constant 0 : index
    %c0_137 = arith.constant 0 : index
    %469 = vector.load %arg6[%c0_136, %c0_137] : memref<32x128xbf16, #tpu.memory_space<vmem>>, vector<32x128xbf16>
    %cst_138 = arith.constant dense<0.000000e+00> : vector<64x128xf32>
    %470 = tpu.matmul %468, %469, %cst_138 {dimension_numbers = #tpu.dot_dimension_numbers<[1], [0], [0], [1], [0, 0, 1, 1], [], []>} : vector<64x32xbf16>, vector<32x128xbf16>, vector<64x128xf32> -> vector<64x128xf32>
    %c0_139 = arith.constant 0 : index
    %c0_140 = arith.constant 0 : index
    %471 = vector.load %arg7[%c0_139, %c0_140] : memref<1x128xf32, #tpu.memory_space<vmem>>, vector<1x128xf32>
    %472 = vector.broadcast %471 : vector<1x128xf32> to vector<64x128xf32>
    %473 = arith.addf %470, %472 : vector<64x128xf32>
    %474 = arith.truncf %473 : vector<64x128xf32> to vector<64x128xbf16>
    %c0_141 = arith.constant 0 : index
    %c0_142 = arith.constant 0 : index
    %c0_143 = arith.constant 0 : index
    %475 = vector.load %arg8[%c0_141, %c0_142, %c0_143] : memref<1x64x128xbf16, #tpu.memory_space<vmem>>, vector<1x64x128xbf16>
    %476 = vector.shape_cast %475 : vector<1x64x128xbf16> to vector<64x128xbf16>
    %477 = vector.shape_cast %474 : vector<64x128xbf16> to vector<1x64x128xbf16>
    tpu.vector_store %arg8[%c0_141, %c0_142, %c0_143], %477 {strides = array<i32>} : memref<1x64x128xbf16, #tpu.memory_space<vmem>>, vector<1x64x128xbf16>,
    return
  }
  func.func @transform_0(%arg0: i32) -> (i32, i32, i32) {
    %c0_i32 = arith.constant 0 : i32
    %c0_i32_0 = arith.constant 0 : i32
    %c0_i32_1 = arith.constant 0 : i32
    return %arg0, %c0_i32, %c0_i32_0 : i32, i32, i32
  }
  func.func @transform_1(%arg0: i32) -> (i32, i32) {
    %c0_i32 = arith.constant 0 : i32
    %c0_i32_0 = arith.constant 0 : i32
    %c0_i32_1 = arith.constant 0 : i32
    return %c0_i32, %c0_i32_0 : i32, i32
  }
  func.func @transform_2(%arg0: i32) -> (i32, i32, i32) {
    %c0_i32 = arith.constant 0 : i32
    %c0_i32_0 = arith.constant 0 : i32
    %c0_i32_1 = arith.constant 0 : i32
    %c0_i32_2 = arith.constant 0 : i32
    return %c0_i32, %c0_i32_0, %c0_i32_1 : i32, i32, i32
  }
  func.func @transform_3(%arg0: i32) -> (i32, i32, i32) {
    %c0_i32 = arith.constant 0 : i32
    %c0_i32_0 = arith.constant 0 : i32
    %c0_i32_1 = arith.constant 0 : i32
    %c0_i32_2 = arith.constant 0 : i32
    return %c0_i32, %c0_i32_0, %c0_i32_1 : i32, i32, i32
  }
  func.func @transform_4(%arg0: i32) -> (i32, i32, i32) {
    %c0_i32 = arith.constant 0 : i32
    %c0_i32_0 = arith.constant 0 : i32
    %c0_i32_1 = arith.constant 0 : i32
    %c0_i32_2 = arith.constant 0 : i32
    return %c0_i32, %c0_i32_0, %c0_i32_1 : i32, i32, i32
  }
  func.func @transform_5(%arg0: i32) -> (i32, i32) {
    %c0_i32 = arith.constant 0 : i32
    %c0_i32_0 = arith.constant 0 : i32
    %c0_i32_1 = arith.constant 0 : i32
    return %c0_i32, %c0_i32_0 : i32, i32
  }
  func.func @transform_6(%arg0: i32) -> (i32, i32) {
    %c0_i32 = arith.constant 0 : i32
    %c0_i32_0 = arith.constant 0 : i32
    %c0_i32_1 = arith.constant 0 : i32
    return %c0_i32, %c0_i32_0 : i32, i32
  }
  func.func @transform_7(%arg0: i32) -> (i32, i32, i32) {
    %c0_i32 = arith.constant 0 : i32
    %c0_i32_0 = arith.constant 0 : i32
    %c0_i32_1 = arith.constant 0 : i32
    return %arg0, %c0_i32, %c0_i32_0 : i32, i32, i32
  }
  func.func @transform_8(%arg0: i32) -> (i32, i32, i32) {
    %c0_i32 = arith.constant 0 : i32
    %c0_i32_0 = arith.constant 0 : i32
    %c0_i32_1 = arith.constant 0 : i32
    return %c0_i32, %arg0, %c0_i32_0 : i32, i32, i32
  }
  func.func @transform_9(%arg0: i32) -> (i32, i32, i32) {
    %c0_i32 = arith.constant 0 : i32
    %c0_i32_0 = arith.constant 0 : i32
    %c0_i32_1 = arith.constant 0 : i32
    return %c0_i32, %arg0, %c0_i32_0 : i32, i32, i32
  }
}

</mosaic_0001>

<bundles_post_ra>
// kernel: char_lstm_forward.1
= control target key start
LH: loop header
LB: loop body
LE: loop exit
PB: predicated region body
PF: predicated region fallthrough
CT: control target
= control target key end

     0   :  { %v2742_v0 = vmov 0   ;;  %v38_v17 = vlaneseq  ;;  %v2743_v23 = vmov 1.0|1.0   ;;  %v2744_v30 = vmov 0.0   ;;  %s2746_s28 = smov 32   ;;  %s2747_s29 = smov 64   ;;  %s3226_s0 = inlined_call_operand.vmem [shape: s32[1,64,1], index: 0, kind: input, shape index: {}]   ;;  %s3227_s1 = inlined_call_operand.vmem [shape: bf16[128,32], index: 1, kind: input, shape index: {}]   ;;  %s3228_s2 = inlined_call_operand.vmem [shape: bf16[2,32,128], index: 2, kind: input, shape index: {}]   ;;  %s3229_s3 = inlined_call_operand.vmem [shape: bf16[2,32,128], index: 3, kind: input, shape index: {}]   ;;  %s3230_s4 = inlined_call_operand.vmem [shape: f32[2,1,128], index: 4, kind: input, shape index: {}]   ;;  %s3231_s5 = inlined_call_operand.vmem [shape: bf16[32,128], index: 5, kind: input, shape index: {}]   ;;  %s3232_s9 = inlined_call_operand.vmem [shape: f32[2,8,32], index: 9, kind: output, shape index: {2}]   ;;  %s3233_s8 = inlined_call_operand.vmem [shape: f32[2,8,32], index: 8, kind: output, shape index: {1}]   ;;  %s3234_s6 = inlined_call_operand.vmem [shape: f32[1,128], index: 6, kind: input, shape index: {}]   ;;  %s3235_s7 = inlined_call_operand.vmem [shape: bf16[1,64,128], index: 7, kind: output, shape index: {0}]  }
   0x1   :  { %2582 = vset.pattern.permute.xlu1 %v2742_v0  ;;  %2581 = vset.pattern.permute.xlu0 %v2742_v0  ;;  %v32_v1 = vld [vmem:[%s3226_s0 + $0x10] sm:$0xff]  ;;  %v30_v2 = vld [vmem:[%s3226_s0] sm:$0xff]  ;;  %v33_v3 = vld [vmem:[%s3226_s0 + $0x18] sm:$0xff]  ;;  %vm2745_vm12 = vmmov 0   ;;  %vm248_vm13 = vcmask 261120   ;;  %vm459_vm14 = vcmask 257024  }
   0x2   :  { %47 = vperm.xlu1 %2582, %v32_v1   ;;  %41 = vperm.xlu0 %2581, %v30_v2   ;;  %v31_v4 = vld [vmem:[%s3226_s0 + $0x8] sm:$0xff]  ;;  %v2588_v5 = vld [vmem:[%s3227_s1 + $0x38] sm:$0xff]   ;;  %v2589_v6 = vld [vmem:[%s3227_s1 + $0x30] sm:$0xff]   ;;  %v39_v20 = vand.u32 127, %v38_v17 }
   0x3   :  { %v35_v7 = vld [vmem:[%s3226_s0 + $0x28] sm:$0xff]  ;;  %v34_v8 = vld [vmem:[%s3226_s0 + $0x20] sm:$0xff]  ;;  %2386 = vmatprep.subr.bf16.mxu0 %v2588_v5  ;;  %v37_v10 = vld [vmem:[%s3226_s0 + $0x38] sm:$0xff] }
   0x4   :  { %2387 = vmatpush3.bf16.msra.mxu0 %v2588_v5  ;;  %v2590_v9 = vld [vmem:[%s3227_s1 + $0x28] sm:$0xff]   ;;  %v36_v11 = vld [vmem:[%s3226_s0 + $0x30] sm:$0xff]  ;;  %v2591_v12 = vld [vmem:[%s3227_s1 + $0x20] sm:$0xff]  }
   0x5   :  { %2388 = vmatprep.subr.bf16.mxu0 %v2589_v6  ;;  %v2592_v13 = vld [vmem:[%s3227_s1 + $0x18] sm:$0xff]   ;;  %v2593_v14 = vld [vmem:[%s3227_s1 + $0x10] sm:$0xff]   ;;  %v2594_v15 = vld [vmem:[%s3227_s1 + $0x8] sm:$0xff]  }
   0x6   :  { %50 = vperm.xlu1 %2582, %v33_v3   ;;  %44 = vperm.xlu0 %2581, %v31_v4   ;;  %v2595_v16 = vld [vmem:[%s3227_s1] sm:$0xff]   ;;  %v2596_v28 = vld [vmem:[%s3228_s2 + $0x8] sm:$0xff]  }
   0x7   :  { %2410 = vmatprep.subr.bf16.mxu1 %v2596_v28  ;;  %v2597_v29 = vld [vmem:[%s3228_s2] sm:$0xff]   ;;  %v2860_v31 = vld [vmem:[%s3229_s3 + $0x8] sm:$0xff]  }
   0x8   :  { %2389 = vmatpush3.bf16.msra.mxu0 %v2589_v6  ;;  %2411 = vmatpush3.bf16.msra.mxu1 %v2596_v28  ;;  %v2869_v32 = vld [vmem:[%s3229_s3] sm:$0xff]  }
   0x9   :  { %2390 = vmatprep.subr.bf16.mxu0 %v2590_v9  ;;  %2412 = vmatprep.subr.bf16.mxu1 %v2597_v29  ;;  %v2085_v46 = vld [vmem:[%s3230_s4] ss:$0 sm:$0xff] }
   0xa   :  { %56 = vperm.xlu1 %2582, %v35_v7   ;;  %53 = vperm.xlu0 %2581, %v34_v8  }
   0xc   :  { %2391 = vmatpush3.bf16.msra.mxu0 %v2590_v9  ;;  %2413 = vmatpush3.bf16.msra.mxu1 %v2597_v29 }
   0xd   :  { %2392 = vmatprep.subr.bf16.mxu0 %v2591_v12  ;;  %2422 = vmatprep.subr.bf16.mxu1 %v2744_v30 }
   0xe   :  { %62 = vperm.xlu1 %2582, %v37_v10   ;;  %59 = vperm.xlu0 %2581, %v36_v11  }
  0x10   :  { %2393 = vmatpush3.bf16.msra.mxu0 %v2591_v12 }
  0x11   :  { %2394 = vmatprep.subr.bf16.mxu0 %v2592_v13 }
  0x14   :  { %2395 = vmatpush3.bf16.msra.mxu0 %v2592_v13 }
  0x15   :  { %2396 = vmatprep.subr.bf16.mxu0 %v2593_v14 }
  0x18   :  { %2397 = vmatpush3.bf16.msra.mxu0 %v2593_v14 }
  0x19   :  { %2398 = vmatprep.subr.bf16.mxu0 %v2594_v15 }
  0x1c   :  { %2399 = vmatpush3.bf16.msra.mxu0 %v2594_v15 }
  0x1d   :  { %2400 = vmatprep.subr.bf16.mxu0 %v2595_v16 }
  0x20   :  { %2401 = vmatpush3.bf16.msra.mxu0 %v2595_v16 }
  0x21   :  { %2446 = vmatprep.subr.bf16.mxu0 %v2744_v30 }
  0x7d   :  { %v48_v18 = vpop.permute.xlu1 %47  ;;  %v42_v19 = vpop.permute.xlu0 %41 }
  0x7e   :  { %vm66_vm0 = vcmp.eq.s32.totalorder %v39_v20, %v48_v18  ;;  %vm64_vm3 = vcmp.eq.s32.totalorder %v39_v20, %v42_v19 }
  0x81   :  { %v51_v21 = vpop.permute.xlu1 %50  ;;  %v45_v22 = vpop.permute.xlu0 %44 }
  0x82   :  { %vm67_vm1 = vcmp.eq.s32.totalorder %v39_v20, %v51_v21  ;;  %vm65_vm2 = vcmp.eq.s32.totalorder %v39_v20, %v45_v22 }
  0x83   :  { %vm2079_vm4 = vmpackc.low %vm67_vm1, %vm66_vm0 }
  0x84   :  { %vm2077_vm5 = vmpackc.low %vm65_vm2, %vm64_vm3 }
  0x85   :  { %2402 = vmatprep.mubr.msk.bf16.mxu0 %vm2077_vm5, %v2743_v23  ;;  %v57_v24 = vpop.permute.xlu1 %56  ;;  %v54_v25 = vpop.permute.xlu0 %53 }
  0x86   :  { %vm69_vm6 = vcmp.eq.s32.totalorder %v39_v20, %v57_v24  ;;  %2403 = vmatmul.mubr.msk.bf16.vlgmr.msra.gmra.mxu0 %vm2079_vm4, %v2743_v23  ;;  %vm68_vm7 = vcmp.eq.s32.totalorder %v39_v20, %v54_v25 }
  0x87   :  { %vm2081_vm8 = vmpackc.low %vm69_vm6, %vm68_vm7  ;;  %2447 = vmatpush3.bf16.msra.mxu0 %v2860_v31 }
  0x88   :  { %2406 = vmatprep.mubr.msk.bf16.mxu0 %vm2081_vm8, %v2743_v23  ;;  %2448 = vmatprep.subr.bf16.mxu0 %v2744_v30 }
  0x89   :  { %v63_v26 = vpop.permute.xlu1 %62  ;;  %v60_v27 = vpop.permute.xlu0 %59 }
  0x8a   :  { %vm71_vm9 = vcmp.eq.s32.totalorder %v39_v20, %v63_v26  ;;  %vm70_vm10 = vcmp.eq.s32.totalorder %v39_v20, %v60_v27 }
  0x8b   :  { %vm2083_vm11 = vmpackc.low %vm71_vm9, %vm70_vm10  ;;  %2449 = vmatpush3.bf16.msra.mxu0 %v2869_v32 }
  0x8c   :  { %2462 = vmatprep.subr.bf16.mxu0 %v2744_v30 }
  0x8e   :  { %2407 = vmatmul.mubr.msk.bf16.gmra.mxu0 %vm2083_vm11, %v2743_v23 }
  0x8f   :  { %2450 = vmatprep.mubr.msk.bf16.mxu0 %vm2745_vm12, %v2744_v30 }
 0x146   :  { %v2404_v33 = vpop.f32.mrf.mxu0 }
 0x148   :  { %v190_v34 = vpop.f32.mrf.mxu0 }
 0x14a   :  { %v2405_v35 = vpop.f32.mrf.mxu0 }
 0x14b   :  { %v222_v38 = vpack.c.bf16 %v2405_v35, %v2404_v33 }
 0x14c   :  { %v193_v36 = vpop.f32.mrf.mxu0 }
 0x14d   :  { %v221_v37 = vpack.c.bf16 %v193_v36, %v190_v34 }
 0x14e   :  { %v2408_v39 = vpop.f32.mrf.mxu0 }
 0x14f   :  { %2414 = vmatprep.mubr.msk.bf16.mxu1 %vm248_vm13, %v221_v37 }
 0x150   :  { %v206_v40 = vpop.f32.mrf.mxu0  ;;  %2415 = vmatmul.mubr.msk.bf16.vlgmr.msra.gmra.mxu1 %vm248_vm13, %v222_v38 }
 0x151   :  { %2423 = vmatpush3.bf16.msra.mxu1 %v2860_v31 }
 0x152   :  { %v2409_v41 = vpop.f32.mrf.mxu0  ;;  %2424 = vmatprep.subr.bf16.mxu1 %v2744_v30 }
 0x153   :  { %v224_v44 = vpack.c.bf16 %v2409_v41, %v2408_v39 }
 0x154   :  { %v209_v42 = vpop.f32.mrf.mxu0 }
 0x155   :  { %v223_v43 = vpack.c.bf16 %v209_v42, %v206_v40  ;;  %2425 = vmatpush3.bf16.msra.mxu1 %v2869_v32 }
 0x156   :  { %2430 = vmatprep.subr.bf16.mxu1 %v2744_v30 }
 0x157   :  { %2418 = vmatprep.mubr.msk.bf16.mxu1 %vm248_vm13, %v223_v43 }
 0x158   :  { %2419 = vmatmul.mubr.msk.bf16.gmra.mxu1 %vm248_vm13, %v224_v44 }
 0x159   :  { %2426 = vmatprep.mubr.msk.bf16.mxu1 %vm2745_vm12, %v2744_v30 }
 0x160   :  { %2427 = vmatmul.mubr.bf16.vlgmr.msra.gmra.mxu1 %v2742_v0 }
 0x161   :  { %2431 = vmatpush3.bf16.msra.mxu1 %v2860_v31  ;;  %2434 = vmatprep.mubr.msk.bf16.mxu1 %vm2745_vm12, %v2744_v30 }
 0x162   :  { %2432 = vmatprep.subr.bf16.mxu1 %v2744_v30 }
 0x165   :  { %2433 = vmatpush3.bf16.msra.mxu1 %v2869_v32 }
 0x166   :  { %2438 = vmatprep.subr.bf16.mxu1 %v2744_v30 }
 0x210   :  { %v2416_v45 = vpop.f32.mrf.mxu1 }
 0x211   :  { %v304_v49 = vadd.f32 %v2416_v45, %v2085_v46 }
 0x212   :  { %v295_v47 = vpop.f32.mrf.mxu1 }
 0x213   :  { %v296_v52 = vadd.f32 %v2085_v46, %v295_v47 }
 0x214   :  { %v2417_v48 = vpop.f32.mrf.mxu1 }
 0x215   :  { %v307_v50 = vadd.f32 %v2417_v48, %v2085_v46 }
 0x216   :  { %v298_v51 = vpop.f32.mrf.mxu1 }
 0x217   :  { %v2247_v53 = vpack.c.bf16 %v307_v50, %v304_v49  ;;  %v299_v54 = vadd.f32 %v2085_v46, %v298_v51 }
 0x218   :  { %v2420_v55 = vpop.f32.mrf.mxu1 }
 0x219   :  { %2299 = vst [vmem:[#allocation3 + $0x8] sm:$0xff] %v2247_v53   ;;  %v2242_v56 = vpack.c.bf16 %v299_v54, %v296_v52  ;;  %v320_v59 = vadd.f32 %v2420_v55, %v2085_v46 }
 0x21a   :  { %v311_v57 = vpop.f32.mrf.mxu1 }
 0x21b   :  { %2243 = vst [vmem:[#allocation3] sm:$0xff] %v2242_v56   ;;  %v312_v62 = vadd.f32 %v2085_v46, %v311_v57 }
 0x21c   :  { %v2421_v58 = vpop.f32.mrf.mxu1 }
 0x21d   :  { %v323_v60 = vadd.f32 %v2421_v58, %v2085_v46 }
 0x21e   :  { %v314_v61 = vpop.f32.mrf.mxu1 }
 0x21f   :  { %v2257_v63 = vpack.c.bf16 %v323_v60, %v320_v59  ;;  %v315_v1 = vadd.f32 %v2085_v46, %v314_v61 }
 0x220   :  { %v421_v2 = vpop.f32.mrf.mxu1  ;;  %v544_v49 = vld [vmem:[#allocation3 + $0x8] sm:$0xff]  }
 0x221   :  { %2301 = vst [vmem:[#allocation3 + $0x18] sm:$0xff] %v2257_v63   ;;  %v2252_v3 = vpack.c.bf16 %v315_v1, %v312_v62  ;;  %v545_v50 = vunpack.c.l.bf16 %v544_v49 }
 0x222   :  { %v370_v4 = vld [vmem:[#allocation3] sm:$0xff]   ;;  %v2428_v5 = vpop.f32.mrf.mxu1 }
 0x223   :  { %2300 = vst [vmem:[#allocation3 + $0x10] sm:$0xff] %v2252_v3   ;;  %v371_v6 = vunpack.c.l.bf16 %v370_v4  ;;  %v463_v25 = vunpack.c.h.bf16 %v370_v4 }
 0x224   :  { %v424_v7 = vpop.f32.mrf.mxu1 }
 0x225   :  { %v427_v8 = vadd.f32 %v421_v2, %v371_v6 }
 0x226   :  { %v2429_v9 = vpop.f32.mrf.mxu1 }
 0x227   :  { %2614 = vtanh.f32 %v427_v8  ;;  %v2102_v11 = vmul.f32 -1.442695, %v427_v8  ;;  %v627_v8 = vunpack.c.h.bf16 %v544_v49 }
 0x229   :  { %2616 = vpow2.f32 %v2102_v11 }
 0x234   :  { %v2615_v10 = vpop.eup %2614 }
 0x235   :  { %437 = vrot.lane.b32.xlu0 %v2615_v10, %s2746_s28 }
 0x236   :  { %v2617_v12 = vpop.eup %2616 }
 0x237   :  { %v431_v13 = vadd.f32 1.0, %v2617_v12 }
 0x239   :  { %2618 = vrcp.f32 %v431_v13 }
 0x246   :  { %v2619_v14 = vpop.eup %2618 }
 0x247   :  { %v435_v17 = vmul.f32 0.0, %v2619_v14 }
 0x2a7   :  { %v438_v15 = vpop.permute.xlu0 %437 }
 0x2a8   :  { %v440_v16 = vmul.f32 %v2619_v14, %v438_v15 }
 0x2aa   :  { %442 = vrot.lane.b32.xlu1 %v440_v16, %s2746_s28 }
 0x31c   :  { %v443_v18 = vpop.permute.xlu1 %442 }
 0x31d   :  { %v445_v19 = vadd.f32 %v443_v18, %v435_v17 }
 0x31f   :  { %2620 = vtanh.f32 %v445_v19 }
 0x32c   :  { %v2621_v20 = vpop.eup %2620 }
 0x32d   :  { %448 = vrot.lane.b32.xlu0 %v2621_v20, %s2746_s28 }
 0x39f   :  { %v449_v21 = vpop.permute.xlu0 %448 }
 0x3a0   :  { %v451_v22 = vmul.f32 %v2619_v14, %v449_v21 }
 0x3a2   :  { %v2896_v23 = vpack.c.bf16 %v451_v22, %v451_v22 }
 0x3a4   :  { %464 = vrot.lane.b32.xlu1 %v2896_v23, %s2747_s29 }
 0x416   :  { %v465_v24 = vpop.permute.xlu1 %464 }
 0x417   :  { %2435 = vmatmul.mubr.msk.bf16.vlgmr.msra.gmra.mxu1 %vm248_vm13, %v465_v24 }
 0x418   :  { %2439 = vmatpush3.bf16.msra.mxu1 %v2860_v31  ;;  %2442 = vmatprep.mubr.msk.bf16.mxu1 %vm2745_vm12, %v2744_v30 }
 0x419   :  { %2440 = vmatprep.subr.bf16.mxu1 %v2744_v30 }
 0x41c   :  { %2441 = vmatpush3.bf16.msra.mxu1 %v2869_v32 }
 0x41d   :  { %2454 = vmatprep.subr.bf16.mxu1 %v2744_v30 }
 0x4d7   :  { %v503_v26 = vpop.f32.mrf.mxu1 }
 0x4d8   :  { %v509_v27 = vadd.f32 %v503_v26, %v463_v25 }
 0x4d9   :  { %v2436_v28 = vpop.f32.mrf.mxu1 }
 0x4da   :  { %2622 = vtanh.f32 %v509_v27  ;;  %v2105_v35 = vmul.f32 -1.442695, %v509_v27 }
 0x4db   :  { %v506_v29 = vpop.f32.mrf.mxu1 }
 0x4dc   :  { %2624 = vpow2.f32 %v2105_v35 }
 0x4dd   :  { %v2437_v33 = vpop.f32.mrf.mxu1 }
 0x4de   :  { %v708_v33 = vld [vmem:[#allocation3 + $0x10] sm:$0xff]  }
 0x4e7   :  { %v2623_v34 = vpop.eup %2622 }
 0x4e8   :  { %519 = vrot.lane.b32.xlu0 %v2623_v34, %s2746_s28  ;;  %v709_v34 = vunpack.c.l.bf16 %v708_v33 }
 0x4e9   :  { %v2625_v36 = vpop.eup %2624 }
 0x4ea   :  { %v513_v37 = vadd.f32 1.0, %v2625_v36 }
 0x4ec   :  { %2626 = vrcp.f32 %v513_v37 }
 0x4f9   :  { %v2627_v38 = vpop.eup %2626 }
 0x4fa   :  { %v517_v41 = vmul.f32 %v2627_v38, %v445_v19 }
 0x55a   :  { %v520_v39 = vpop.permute.xlu0 %519 }
 0x55b   :  { %v522_v40 = vmul.f32 %v2627_v38, %v520_v39 }
 0x55d   :  { %524 = vrot.lane.b32.xlu1 %v522_v40, %s2746_s28 }
 0x5cf   :  { %v525_v42 = vpop.permute.xlu1 %524 }
 0x5d0   :  { %v527_v43 = vadd.f32 %v525_v42, %v517_v41 }
 0x5d2   :  { %2628 = vtanh.f32 %v527_v43 }
 0x5df   :  { %v2629_v44 = vpop.eup %2628 }
 0x5e0   :  { %530 = vrot.lane.b32.xlu0 %v2629_v44, %s2746_s28 }
 0x652   :  { %v531_v45 = vpop.permute.xlu0 %530 }
 0x653   :  { %v533_v46 = vmul.f32 %v2627_v38, %v531_v45 }
 0x655   :  { %v2910_v47 = vpack.c.bf16 %v533_v46, %v533_v46 }
 0x657   :  { %546 = vrot.lane.b32.xlu1 %v2910_v47, %s2747_s29 }
 0x6c9   :  { %v547_v48 = vpop.permute.xlu1 %546 }
 0x6ca   :  { %2443 = vmatmul.mubr.msk.bf16.vlgmr.msra.gmra.mxu1 %vm248_vm13, %v547_v48 }
 0x6cb   :  { %2455 = vmatpush3.bf16.msra.mxu1 %v2860_v31  ;;  %2458 = vmatprep.mubr.msk.bf16.mxu1 %vm2745_vm12, %v2744_v30 }
 0x6cc   :  { %2456 = vmatprep.subr.bf16.mxu1 %v2744_v30 }
 0x6cf   :  { %2457 = vmatpush3.bf16.msra.mxu1 %v2869_v32 }
 0x6d0   :  { %2470 = vmatprep.subr.bf16.mxu1 %v2744_v30 }
 0x78a   :  { %v585_v51 = vpop.f32.mrf.mxu1 }
 0x78b   :  { %v591_v52 = vadd.f32 %v585_v51, %v545_v50 }
 0x78c   :  { %v2444_v53 = vpop.f32.mrf.mxu1 }
 0x78d   :  { %2630 = vtanh.f32 %v591_v52  ;;  %v2108_v57 = vmul.f32 -1.442695, %v591_v52 }
 0x78e   :  { %v588_v54 = vpop.f32.mrf.mxu1 }
 0x78f   :  { %2632 = vpow2.f32 %v2108_v57 }
 0x790   :  { %v2445_v55 = vpop.f32.mrf.mxu1 }
 0x79a   :  { %v2631_v56 = vpop.eup %2630 }
 0x79b   :  { %601 = vrot.lane.b32.xlu0 %v2631_v56, %s2746_s28  ;;  %v791_v56 = vunpack.c.h.bf16 %v708_v33 }
 0x79c   :  { %v2633_v58 = vpop.eup %2632 }
 0x79d   :  { %v595_v59 = vadd.f32 1.0, %v2633_v58 }
 0x79f   :  { %2634 = vrcp.f32 %v595_v59 }
 0x7ac   :  { %v2635_v60 = vpop.eup %2634 }
 0x7ad   :  { %v599_v63 = vmul.f32 %v2635_v60, %v527_v43 }
 0x80d   :  { %v602_v61 = vpop.permute.xlu0 %601 }
 0x80e   :  { %v604_v62 = vmul.f32 %v2635_v60, %v602_v61 }
 0x810   :  { %606 = vrot.lane.b32.xlu1 %v604_v62, %s2746_s28 }
 0x882   :  { %v607_v1 = vpop.permute.xlu1 %606 }
 0x883   :  { %v609_v2 = vadd.f32 %v607_v1, %v599_v63 }
 0x885   :  { %2636 = vtanh.f32 %v609_v2 }
 0x892   :  { %v2637_v3 = vpop.eup %2636 }
 0x893   :  { %612 = vrot.lane.b32.xlu0 %v2637_v3, %s2746_s28 }
 0x905   :  { %v613_v4 = vpop.permute.xlu0 %612 }
 0x906   :  { %v615_v5 = vmul.f32 %v2635_v60, %v613_v4 }
 0x908   :  { %v2924_v6 = vpack.c.bf16 %v615_v5, %v615_v5 }
 0x90a   :  { %628 = vrot.lane.b32.xlu1 %v2924_v6, %s2747_s29 }
 0x97c   :  { %v629_v7 = vpop.permute.xlu1 %628 }
 0x97d   :  { %2451 = vmatmul.mubr.msk.bf16.vlgmr.msra.gmra.mxu0 %vm248_vm13, %v629_v7 }
 0x97e   :  { %2463 = vmatpush3.bf16.msra.mxu0 %v2860_v31  ;;  %2466 = vmatprep.mubr.msk.bf16.mxu0 %vm2745_vm12, %v2744_v30 }
 0x97f   :  { %2464 = vmatprep.subr.bf16.mxu0 %v2744_v30 }
 0x982   :  { %2465 = vmatpush3.bf16.msra.mxu0 %v2869_v32 }
 0x983   :  { %2478 = vmatprep.subr.bf16.mxu0 %v2744_v30 }
 0xa3d   :  { %v667_v9 = vpop.f32.mrf.mxu0 }
 0xa3e   :  { %v673_v10 = vadd.f32 %v667_v9, %v627_v8 }
 0xa3f   :  { %v2452_v11 = vpop.f32.mrf.mxu0 }
 0xa40   :  { %2638 = vtanh.f32 %v673_v10  ;;  %v2111_v15 = vmul.f32 -1.442695, %v673_v10 }
 0xa41   :  { %v670_v12 = vpop.f32.mrf.mxu0 }
 0xa42   :  { %2640 = vpow2.f32 %v2111_v15 }
 0xa43   :  { %v2453_v13 = vpop.f32.mrf.mxu0 }
 0xa44   :  { %v2970_v13 = vld [vmem:[#allocation3 + $0x18] sm:$0xff]  }
 0xa4d   :  { %v2639_v14 = vpop.eup %2638 }
 0xa4e   :  { %683 = vrot.lane.b32.xlu0 %v2639_v14, %s2746_s28  ;;  %v873_v14 = vunpack.c.l.bf16 %v2970_v13 }
 0xa4f   :  { %v2641_v16 = vpop.eup %2640 }
 0xa50   :  { %v677_v17 = vadd.f32 1.0, %v2641_v16 }
 0xa52   :  { %2642 = vrcp.f32 %v677_v17 }
 0xa5f   :  { %v2643_v18 = vpop.eup %2642 }
 0xa60   :  { %v681_v21 = vmul.f32 %v2643_v18, %v609_v2 }
 0xac0   :  { %v684_v19 = vpop.permute.xlu0 %683 }
 0xac1   :  { %v686_v20 = vmul.f32 %v2643_v18, %v684_v19 }
 0xac3   :  { %688 = vrot.lane.b32.xlu1 %v686_v20, %s2746_s28 }
 0xb35   :  { %v689_v22 = vpop.permute.xlu1 %688 }
 0xb36   :  { %v691_v24 = vadd.f32 %v689_v22, %v681_v21 }
 0xb38   :  { %2644 = vtanh.f32 %v691_v24 }
 0xb45   :  { %v2645_v25 = vpop.eup %2644 }
 0xb46   :  { %694 = vrot.lane.b32.xlu0 %v2645_v25, %s2746_s28 }
 0xbb8   :  { %v695_v26 = vpop.permute.xlu0 %694 }
 0xbb9   :  { %v697_v27 = vmul.f32 %v2643_v18, %v695_v26 }
 0xbbb   :  { %v2938_v28 = vpack.c.bf16 %v697_v27, %v697_v27 }
 0xbbd   :  { %710 = vrot.lane.b32.xlu1 %v2938_v28, %s2747_s29 }
 0xc2f   :  { %v711_v29 = vpop.permute.xlu1 %710 }
 0xc30   :  { %2459 = vmatmul.mubr.msk.bf16.vlgmr.msra.gmra.mxu1 %vm248_vm13, %v711_v29 }
 0xc31   :  { %2471 = vmatpush3.bf16.msra.mxu1 %v2860_v31  ;;  %2474 = vmatprep.mubr.msk.bf16.mxu1 %vm2745_vm12, %v2744_v30 }
 0xc32   :  { %2472 = vmatprep.subr.bf16.mxu1 %v2744_v30 }
 0xc35   :  { %2473 = vmatpush3.bf16.msra.mxu1 %v2869_v32 }
 0xcf0   :  { %v749_v35 = vpop.f32.mrf.mxu1 }
 0xcf1   :  { %v755_v36 = vadd.f32 %v749_v35, %v709_v34 }
 0xcf2   :  { %v2460_v37 = vpop.f32.mrf.mxu1 }
 0xcf3   :  { %2646 = vtanh.f32 %v755_v36  ;;  %v2114_v41 = vmul.f32 -1.442695, %v755_v36 }
 0xcf4   :  { %v752_v38 = vpop.f32.mrf.mxu1 }
 0xcf5   :  { %2648 = vpow2.f32 %v2114_v41 }
 0xcf6   :  { %v2461_v39 = vpop.f32.mrf.mxu1 }
 0xd00   :  { %v2647_v40 = vpop.eup %2646 }
 0xd01   :  { %765 = vrot.lane.b32.xlu0 %v2647_v40, %s2746_s28 }
 0xd02   :  { %v2649_v42 = vpop.eup %2648 }
 0xd03   :  { %v759_v43 = vadd.f32 1.0, %v2649_v42 }
 0xd05   :  { %2650 = vrcp.f32 %v759_v43 }
 0xd12   :  { %v2651_v44 = vpop.eup %2650 }
 0xd13   :  { %v763_v48 = vmul.f32 %v2651_v44, %v691_v24 }
 0xd73   :  { %v766_v45 = vpop.permute.xlu0 %765 }
 0xd74   :  { %v768_v46 = vmul.f32 %v2651_v44, %v766_v45 }
 0xd76   :  { %770 = vrot.lane.b32.xlu1 %v768_v46, %s2746_s28 }
 0xde8   :  { %v771_v49 = vpop.permute.xlu1 %770 }
 0xde9   :  { %v773_v50 = vadd.f32 %v771_v49, %v763_v48  ;;  %v3035_v48 = vld [vmem:[%s3230_s4 + $0x1] ss:$0 sm:$0xff] }
 0xdeb   :  { %2652 = vtanh.f32 %v773_v50 }
 0xdf8   :  { %v2653_v51 = vpop.eup %2652 }
 0xdf9   :  { %776 = vrot.lane.b32.xlu0 %v2653_v51, %s2746_s28 }
 0xe6b   :  { %v777_v52 = vpop.permute.xlu0 %776 }
 0xe6c   :  { %v779_v53 = vmul.f32 %v2651_v44, %v777_v52  ;;  %v3014_v44 = vld [vmem:[%s3229_s3 + $0x10] sm:$0xff]  }
 0xe6e   :  { %v2951_v54 = vpack.c.bf16 %v779_v53, %v779_v53 }
 0xe70   :  { %792 = vrot.lane.b32.xlu1 %v2951_v54, %s2747_s29 }
 0xee2   :  { %v793_v55 = vpop.permute.xlu1 %792 }
 0xee3   :  { %2467 = vmatmul.mubr.msk.bf16.vlgmr.msra.gmra.mxu0 %vm248_vm13, %v793_v55 }
 0xee4   :  { %2479 = vmatpush3.bf16.msra.mxu0 %v2860_v31  ;;  %2482 = vmatprep.mubr.msk.bf16.mxu0 %vm2745_vm12, %v2744_v30 }
 0xee5   :  { %2480 = vmatprep.subr.bf16.mxu0 %v2744_v30 }
 0xee8   :  { %2481 = vmatpush3.bf16.msra.mxu0 %v2869_v32 }
 0xee9   :  { %2498 = vmatprep.subr.bf16.mxu0 %v2744_v30 }
 0xfa3   :  { %v831_v57 = vpop.f32.mrf.mxu0 }
 0xfa4   :  { %v837_v58 = vadd.f32 %v831_v57, %v791_v56 }
 0xfa5   :  { %v2468_v59 = vpop.f32.mrf.mxu0 }
 0xfa6   :  { %2654 = vtanh.f32 %v837_v58  ;;  %v2117_v31 = vmul.f32 -1.442695, %v837_v58 }
 0xfa7   :  { %v834_v60 = vpop.f32.mrf.mxu0 }
 0xfa8   :  { %2656 = vpow2.f32 %v2117_v31 }
 0xfa9   :  { %v2469_v61 = vpop.f32.mrf.mxu0 }
 0xfb3   :  { %v2655_v62 = vpop.eup %2654 }
 0xfb4   :  { %847 = vrot.lane.b32.xlu0 %v2655_v62, %s2746_s28 }
 0xfb5   :  { %v2657_v63 = vpop.eup %2656 }
 0xfb6   :  { %v841_v1 = vadd.f32 1.0, %v2657_v63 }
 0xfb8   :  { %2658 = vrcp.f32 %v841_v1 }
 0xfc5   :  { %v2659_v2 = vpop.eup %2658 }
 0xfc6   :  { %v845_v4 = vmul.f32 %v2659_v2, %v773_v50 }
0x1026   :  { %v848_v3 = vpop.permute.xlu0 %847 }
0x1027   :  { %v850_v32 = vmul.f32 %v2659_v2, %v848_v3 }
0x1029   :  { %852 = vrot.lane.b32.xlu1 %v850_v32, %s2746_s28 }
0x109b   :  { %v853_v5 = vpop.permute.xlu1 %852 }
0x109c   :  { %v855_v7 = vadd.f32 %v853_v5, %v845_v4 }
0x109e   :  { %2660 = vtanh.f32 %v855_v7 }
0x10ab   :  { %v2661_v8 = vpop.eup %2660 }
0x10ac   :  { %858 = vrot.lane.b32.xlu0 %v2661_v8, %s2746_s28 }
0x111e   :  { %v859_v9 = vpop.permute.xlu0 %858 }
0x111f   :  { %v861_v10 = vmul.f32 %v2659_v2, %v859_v9 }
0x1121   :  { %v2965_v11 = vpack.c.bf16 %v861_v10, %v861_v10 }
0x1123   :  { %874 = vrot.lane.b32.xlu1 %v2965_v11, %s2747_s29 }
0x1195   :  { %v875_v12 = vpop.permute.xlu1 %874 }
0x1196   :  { %2475 = vmatmul.mubr.msk.bf16.vlgmr.msra.gmra.mxu1 %vm248_vm13, %v875_v12 }
0x1256   :  { %v913_v15 = vpop.f32.mrf.mxu1 }
0x1257   :  { %v919_v16 = vadd.f32 %v913_v15, %v873_v14 }
0x1258   :  { %v2476_v17 = vpop.f32.mrf.mxu1 }
0x1259   :  { %2662 = vtanh.f32 %v919_v16  ;;  %v2120_v21 = vmul.f32 -1.442695, %v919_v16  ;;  %v955_v16 = vunpack.c.h.bf16 %v2970_v13 }
0x125a   :  { %v916_v18 = vpop.f32.mrf.mxu1 }
0x125b   :  { %2664 = vpow2.f32 %v2120_v21 }
0x125c   :  { %v2477_v19 = vpop.f32.mrf.mxu1 }
0x1266   :  { %v2663_v20 = vpop.eup %2662 }
0x1267   :  { %929 = vrot.lane.b32.xlu0 %v2663_v20, %s2746_s28 }
0x1268   :  { %v2665_v22 = vpop.eup %2664 }
0x1269   :  { %v923_v24 = vadd.f32 1.0, %v2665_v22 }
0x126b   :  { %2666 = vrcp.f32 %v923_v24 }
0x1278   :  { %v2667_v25 = vpop.eup %2666 }
0x1279   :  { %v927_v29 = vmul.f32 %v2667_v25, %v855_v7 }
0x12d9   :  { %v930_v26 = vpop.permute.xlu0 %929 }
0x12da   :  { %v932_v27 = vmul.f32 %v2667_v25, %v930_v26 }
0x12dc   :  { %934 = vrot.lane.b32.xlu1 %v932_v27, %s2746_s28 }
0x12e0   :  { %456 = vrot.lane.b32.xlu1 %v2896_v23, %s2747_s29  ;;  %v2600_v23 = vld [vmem:[%s3228_s2 + $0x18] sm:$0xff]  }
0x12e1   :  { %2486 = vmatprep.subr.bf16.mxu1 %v2600_v23 }
0x12e2   :  { %2487 = vmatpush3.bf16.msra.mxu1 %v2600_v23 }
0x12e4   :  { %620 = vrot.lane.b32.xlu1 %v2924_v6, %s2747_s29  ;;  %v2601_v6 = vld [vmem:[%s3228_s2 + $0x10] sm:$0xff]  }
0x12e5   :  { %2488 = vmatprep.subr.bf16.mxu1 %v2601_v6 }
0x12e6   :  { %2489 = vmatpush3.bf16.msra.mxu1 %v2601_v6 }
0x12e7   :  { %2514 = vmatprep.subr.bf16.mxu1 %v2744_v30 }
0x134e   :  { %v935_v33 = vpop.permute.xlu1 %934 }
0x134f   :  { %v2979_v34 = vadd.f32 %v935_v33, %v927_v29 }
0x1351   :  { %2668 = vtanh.f32 %v2979_v34 }
0x1352   :  { %v457_v35 = vpop.permute.xlu1 %456 }
0x1353   :  { %460 = vst.msk [vmem:[#allocation2] sm:$0xf] %vm459_vm14, %v457_v35 }
0x1356   :  { %v621_v36 = vpop.permute.xlu1 %620 }
0x1357   :  { %624 = vst.msk [vmem:[#allocation2 + $0x8] sm:$0xf] %vm459_vm14, %v621_v36 }
0x135e   :  { %v2669_v37 = vpop.eup %2668 }
0x135f   :  { %940 = vrot.lane.b32.xlu0 %v2669_v37, %s2746_s28 }
0x1363   :  { %538 = vrot.lane.b32.xlu0 %v2910_v47, %s2747_s29 }
0x1367   :  { %702 = vrot.lane.b32.xlu0 %v2938_v28, %s2747_s29  ;;  %v3006_v28 = vld [vmem:[%s3229_s3 + $0x18] sm:$0xff]  }
0x13d1   :  { %v941_v38 = vpop.permute.xlu0 %940 }
0x13d2   :  { %v943_v39 = vmul.f32 %v2667_v25, %v941_v38 }
0x13d4   :  { %v2996_v40 = vpack.c.bf16 %v943_v39, %v943_v39 }
0x13d5   :  { %v539_v41 = vpop.permute.xlu0 %538 }
0x13d6   :  { %542 = vst.msk [vmem:[#allocation2 + $0x4] sm:$0xf] %vm459_vm14, %v539_v41  ;;  %956 = vrot.lane.b32.xlu1 %v2996_v40, %s2747_s29 }
0x13d9   :  { %v703_v42 = vpop.permute.xlu0 %702 }
0x13da   :  { %706 = vst.msk [vmem:[#allocation2 + $0xc] sm:$0xf] %vm459_vm14, %v703_v42 }
0x13dd   :  { %v2602_v43 = vld [vmem:[#allocation2] sm:$0xff]  }
0x13de   :  { %2490 = vmatprep.mubr.msk.bf16.mxu1 %vm248_vm13, %v2602_v43 }
0x13e1   :  { %v2603_v47 = vld [vmem:[#allocation2 + $0x8] sm:$0xff]  }
0x13e2   :  { %2491 = vmatmul.mubr.msk.bf16.vlgmr.msra.gmra.mxu1 %vm248_vm13, %v2603_v47 }
0x13e3   :  { %2515 = vmatpush3.bf16.msra.mxu1 %v3006_v28 }
0x13e4   :  { %2516 = vmatprep.subr.bf16.mxu1 %v2744_v30 }
0x13e7   :  { %2517 = vmatpush3.bf16.msra.mxu1 %v3014_v44 }
0x13e8   :  { %2530 = vmatprep.subr.bf16.mxu1 %v2744_v30 }
0x1448   :  { %v957_v45 = vpop.permute.xlu1 %956 }
0x1449   :  { %2483 = vmatmul.mubr.msk.bf16.vlgmr.msra.gmra.mxu0 %vm248_vm13, %v957_v45 }
0x144a   :  { %2499 = vmatpush3.bf16.msra.mxu0 %v3006_v28  ;;  %2502 = vmatprep.mubr.msk.bf16.mxu0 %vm2745_vm12, %v2744_v30 }
0x144b   :  { %2500 = vmatprep.subr.bf16.mxu0 %v2744_v30 }
0x144e   :  { %2501 = vmatpush3.bf16.msra.mxu0 %v3014_v44 }
0x144f   :  { %2506 = vmatprep.subr.bf16.mxu0 %v2744_v30 }
0x1451   :  { %2503 = vmatmul.mubr.bf16.vlgmr.msra.gmra.mxu0 %v2742_v0 }
0x1452   :  { %2507 = vmatpush3.bf16.msra.mxu0 %v3006_v28  ;;  %2510 = vmatprep.mubr.msk.bf16.mxu0 %vm2745_vm12, %v2744_v30 }
0x1453   :  { %2508 = vmatprep.subr.bf16.mxu0 %v2744_v30 }
0x1456   :  { %2509 = vmatpush3.bf16.msra.mxu0 %v3014_v44 }
0x1457   :  { %2522 = vmatprep.subr.bf16.mxu0 %v2744_v30 }
0x14a2   :  { %v2492_v46 = vpop.f32.mrf.mxu1 }
0x14a3   :  { %v1154_v0 = vadd.f32 %v2492_v46, %v3035_v48 }
0x14a4   :  { %v1145_v49 = vpop.f32.mrf.mxu1 }
0x14a5   :  { %v1146_v53 = vadd.f32 %v3035_v48, %v1145_v49 }
0x14a6   :  { %v2493_v50 = vpop.f32.mrf.mxu1 }
0x14a7   :  { %v1157_v51 = vadd.f32 %v2493_v50, %v3035_v48 }
0x14a8   :  { %v1148_v52 = vpop.f32.mrf.mxu1 }
0x14a9   :  { %v2267_v55 = vpack.c.bf16 %v1157_v51, %v1154_v0  ;;  %v1149_v56 = vadd.f32 %v3035_v48, %v1148_v52 }
0x14ab   :  { %2302 = vst [vmem:[#allocation3 + $0x8] sm:$0xff] %v2267_v55   ;;  %v2262_v57 = vpack.c.bf16 %v1149_v56, %v1146_v53 }
0x14ad   :  { %2263 = vst [vmem:[#allocation3] sm:$0xff] %v2262_v57  }
0x14b4   :  { %v3041_v61 = vld [vmem:[#allocation3] sm:$0xff]  }
0x14b5   :  { %v1222_v31 = vunpack.c.l.bf16 %v3041_v61  ;;  %v1309_v41 = vunpack.c.h.bf16 %v3041_v61 }
0x1509   :  { %v995_v58 = vpop.f32.mrf.mxu0 }
0x150a   :  { %v1001_v18 = vadd.f32 %v995_v58, %v955_v16 }
0x150b   :  { %v2484_v59 = vpop.f32.mrf.mxu0 }
0x150c   :  { %v2123_v21 = vmul.f32 -1.442695, %v1001_v18 }
0x150d   :  { %v998_v60 = vpop.f32.mrf.mxu0 }
0x150f   :  { %v2485_v62 = vpop.f32.mrf.mxu0 }
0x1511   :  { %v1269_v63 = vpop.f32.mrf.mxu0 }
0x1512   :  { %v1275_v1 = vadd.f32 %v1269_v63, %v1222_v31 }
0x1513   :  { %v2504_v2 = vpop.f32.mrf.mxu0 }
0x1514   :  { %2670 = vtanh.f32 %v1275_v1  ;;  %v2155_v5 = vmul.f32 -1.442695, %v1275_v1 }
0x1515   :  { %v1272_v3 = vpop.f32.mrf.mxu0 }
0x1516   :  { %2672 = vpow2.f32 %v2155_v5 }
0x1517   :  { %v2505_v32 = vpop.f32.mrf.mxu0 }
0x1521   :  { %v2671_v4 = vpop.eup %2670 }
0x1522   :  { %1285 = vrot.lane.b32.xlu0 %v2671_v4, %s2746_s28 }
0x1523   :  { %v2673_v7 = vpop.eup %2672 }
0x1524   :  { %v1279_v8 = vadd.f32 1.0, %v2673_v7 }
0x1526   :  { %2674 = vrcp.f32 %v1279_v8 }
0x1533   :  { %v2675_v9 = vpop.eup %2674 }
0x1534   :  { %v1283_v14 = vmul.f32 0.0, %v2675_v9 }
0x1594   :  { %v1286_v10 = vpop.permute.xlu0 %1285 }
0x1595   :  { %v1288_v12 = vmul.f32 %v2675_v9, %v1286_v10 }
0x1597   :  { %1290 = vrot.lane.b32.xlu1 %v1288_v12, %s2746_s28 }
0x1609   :  { %v1291_v15 = vpop.permute.xlu1 %1290 }
0x160a   :  { %v1293_v17 = vadd.f32 %v1291_v15, %v1283_v14  ;;  %v1388_v15 = vld [vmem:[#allocation3 + $0x8] sm:$0xff]  }
0x160b   :  { %v1389_v16 = vunpack.c.l.bf16 %v1388_v15 }
0x160c   :  { %2676 = vtanh.f32 %v1293_v17 }
0x160d   :  { %2678 = vtanh.f32 %v1001_v18 }
0x160e   :  { %2680 = vpow2.f32 %v2123_v21 }
0x1619   :  { %v2677_v19 = vpop.eup %2676 }
0x161a   :  { %1296 = vrot.lane.b32.xlu0 %v2677_v19, %s2746_s28  ;;  %v2679_v20 = vpop.eup %2678 }
0x161b   :  { %v2681_v22 = vpop.eup %2680 }
0x161c   :  { %v1005_v24 = vadd.f32 1.0, %v2681_v22 }
0x161e   :  { %1011 = vrot.lane.b32.xlu0 %v2679_v20, %s2746_s28  ;;  %2682 = vrcp.f32 %v1005_v24 }
0x162b   :  { %v2683_v13 = vpop.eup %2682 }
0x162c   :  { %v1009_v36 = vmul.f32 %v2683_v13, %v2979_v34 }
0x168c   :  { %v1297_v25 = vpop.permute.xlu0 %1296 }
0x168d   :  { %v1299_v26 = vmul.f32 %v2675_v9, %v1297_v25 }
0x168f   :  { %v3049_v27 = vpack.c.bf16 %v1299_v26, %v1299_v26 }
0x1690   :  { %v1012_v29 = vpop.permute.xlu0 %1011 }
0x1691   :  { %v1014_v33 = vmul.f32 %v2683_v13, %v1012_v29  ;;  %1310 = vrot.lane.b32.xlu1 %v3049_v27, %s2747_s29 }
0x1693   :  { %1016 = vrot.lane.b32.xlu0 %v1014_v33, %s2746_s28 }
0x1703   :  { %v1311_v35 = vpop.permute.xlu1 %1310 }
0x1704   :  { %2511 = vmatmul.mubr.msk.bf16.vlgmr.msra.gmra.mxu0 %vm248_vm13, %v1311_v35 }
0x1705   :  { %v1017_v23 = vpop.permute.xlu0 %1016  ;;  %2523 = vmatpush3.bf16.msra.mxu0 %v3006_v28  ;;  %2526 = vmatprep.mubr.msk.bf16.mxu0 %vm2745_vm12, %v2744_v30 }
0x1706   :  { %v3059_v6 = vadd.f32 %v1017_v23, %v1009_v36  ;;  %2524 = vmatprep.subr.bf16.mxu0 %v2744_v30 }
0x1708   :  { %2684 = vtanh.f32 %v3059_v6 }
0x1709   :  { %2525 = vmatpush3.bf16.msra.mxu0 %v3014_v44 }
0x170a   :  { %2538 = vmatprep.subr.bf16.mxu0 %v2744_v30 }
0x1715   :  { %v2685_v37 = vpop.eup %2684 }
0x1716   :  { %1022 = vrot.lane.b32.xlu0 %v2685_v37, %s2746_s28 }
0x171a   :  { %784 = vrot.lane.b32.xlu0 %v2951_v54, %s2747_s29 }
0x171e   :  { %948 = vrot.lane.b32.xlu0 %v2996_v40, %s2747_s29 }
0x1788   :  { %v1023_v34 = vpop.permute.xlu0 %1022 }
0x1789   :  { %v3076_v58 = vmul.f32 %v2683_v13, %v1023_v34 }
0x178b   :  { %v1026_v59 = vpack.c.bf16 %v3076_v58, %v3076_v58 }
0x178c   :  { %v785_v38 = vpop.permute.xlu0 %784 }
0x178d   :  { %788 = vst.msk [vmem:[#allocation2 + $0x10] sm:$0xf] %vm459_vm14, %v785_v38 }
0x1790   :  { %v949_v39 = vpop.permute.xlu0 %948 }
0x1791   :  { %952 = vst.msk [vmem:[#allocation2 + $0x18] sm:$0xf] %vm459_vm14, %v949_v39 }
0x17c4   :  { %v1349_v42 = vpop.f32.mrf.mxu0 }
0x17c5   :  { %v1355_v43 = vadd.f32 %v1349_v42, %v1309_v41  ;;  %v1469_v41 = vunpack.c.h.bf16 %v1388_v15 }
0x17c6   :  { %v2512_v47 = vpop.f32.mrf.mxu0 }
0x17c7   :  { %2686 = vtanh.f32 %v1355_v43  ;;  %v2158_v54 = vmul.f32 -1.442695, %v1355_v43 }
0x17c8   :  { %v1352_v45 = vpop.f32.mrf.mxu0 }
0x17c9   :  { %2688 = vpow2.f32 %v2158_v54 }
0x17ca   :  { %v2513_v46 = vpop.f32.mrf.mxu0 }
0x17d4   :  { %v2687_v49 = vpop.eup %2686 }
0x17d5   :  { %1365 = vrot.lane.b32.xlu1 %v2687_v49, %s2746_s28 }
0x17d6   :  { %v2689_v40 = vpop.eup %2688 }
0x17d7   :  { %v1359_v50 = vadd.f32 1.0, %v2689_v40 }
0x17d9   :  { %2690 = vrcp.f32 %v1359_v50 }
0x17e6   :  { %v2691_v0 = vpop.eup %2690 }
0x17e7   :  { %v1363_v53 = vmul.f32 %v2691_v0, %v1293_v17 }
0x1847   :  { %v1366_v51 = vpop.permute.xlu1 %1365 }
0x1848   :  { %v1368_v52 = vmul.f32 %v2691_v0, %v1366_v51 }
0x184a   :  { %1370 = vrot.lane.b32.xlu1 %v1368_v52, %s2746_s28 }
0x18bc   :  { %v1371_v55 = vpop.permute.xlu1 %1370 }
0x18bd   :  { %v1373_v56 = vadd.f32 %v1371_v55, %v1363_v53 }
0x18bf   :  { %2692 = vtanh.f32 %v1373_v56 }
0x18cc   :  { %v2693_v57 = vpop.eup %2692 }
0x18cd   :  { %1376 = vrot.lane.b32.xlu1 %v2693_v57, %s2746_s28 }
0x18d1   :  { %866 = vrot.lane.b32.xlu1 %v2965_v11, %s2747_s29 }
0x18d5   :  { %1030 = vrot.lane.b32.xlu1 %v1026_v59, %s2747_s29 }
0x193f   :  { %v1377_v60 = vpop.permute.xlu1 %1376 }
0x1940   :  { %v1379_v61 = vmul.f32 %v2691_v0, %v1377_v60 }
0x1942   :  { %v3083_v62 = vpack.c.bf16 %v1379_v61, %v1379_v61 }
0x1943   :  { %v867_v31 = vpop.permute.xlu1 %866 }
0x1944   :  { %870 = vst.msk [vmem:[#allocation2 + $0x14] sm:$0xf] %vm459_vm14, %v867_v31  ;;  %1390 = vrot.lane.b32.xlu0 %v3083_v62, %s2747_s29 }
0x1947   :  { %v1031_v63 = vpop.permute.xlu1 %1030 }
0x1948   :  { %1034 = vst.msk [vmem:[#allocation2 + $0x1c] sm:$0xf] %vm459_vm14, %v1031_v63 }
0x194b   :  { %v2606_v1 = vld [vmem:[#allocation2 + $0x10] sm:$0xff]  }
0x194c   :  { %2494 = vmatprep.mubr.msk.bf16.mxu1 %vm248_vm13, %v2606_v1 }
0x194f   :  { %v2607_v11 = vld [vmem:[#allocation2 + $0x18] sm:$0xff]  }
0x1950   :  { %2495 = vmatmul.mubr.msk.bf16.gmra.mxu1 %vm248_vm13, %v2607_v11 }
0x1951   :  { %2518 = vmatprep.mubr.msk.bf16.mxu1 %vm2745_vm12, %v2744_v30 }
0x19b6   :  { %v1391_v2 = vpop.permute.xlu0 %1390 }
0x19b7   :  { %2519 = vmatmul.mubr.msk.bf16.vlgmr.msra.gmra.mxu1 %vm248_vm13, %v1391_v2 }
0x19b8   :  { %2531 = vmatpush3.bf16.msra.mxu1 %v3006_v28  ;;  %2534 = vmatprep.mubr.msk.bf16.mxu1 %vm2745_vm12, %v2744_v30 }
0x19b9   :  { %2532 = vmatprep.subr.bf16.mxu1 %v2744_v30 }
0x19bc   :  { %2533 = vmatpush3.bf16.msra.mxu1 %v3014_v44 }
0x19bd   :  { %2546 = vmatprep.subr.bf16.mxu1 %v2744_v30 }
0x1a10   :  { %v2496_v3 = vpop.f32.mrf.mxu1 }
0x1a11   :  { %v1170_v5 = vadd.f32 %v2496_v3, %v3035_v48 }
0x1a12   :  { %v1161_v32 = vpop.f32.mrf.mxu1 }
0x1a13   :  { %v1162_v9 = vadd.f32 %v3035_v48, %v1161_v32 }
0x1a14   :  { %v2497_v4 = vpop.f32.mrf.mxu1 }
0x1a15   :  { %v1173_v7 = vadd.f32 %v2497_v4, %v3035_v48 }
0x1a16   :  { %v1164_v8 = vpop.f32.mrf.mxu1 }
0x1a17   :  { %v2277_v10 = vpack.c.bf16 %v1173_v7, %v1170_v5  ;;  %v1165_v12 = vadd.f32 %v3035_v48, %v1164_v8 }
0x1a19   :  { %2304 = vst [vmem:[#allocation3 + $0x18] sm:$0xff] %v2277_v10   ;;  %v2272_v14 = vpack.c.bf16 %v1165_v12, %v1162_v9 }
0x1a1b   :  { %2303 = vst [vmem:[#allocation3 + $0x10] sm:$0xff] %v2272_v14  }
0x1a22   :  { %v1548_v63 = vld [vmem:[#allocation3 + $0x10] sm:$0xff]  }
0x1a23   :  { %v1549_v1 = vunpack.c.l.bf16 %v1548_v63 }
0x1a77   :  { %v1429_v17 = vpop.f32.mrf.mxu1 }
0x1a78   :  { %v1435_v18 = vadd.f32 %v1429_v17, %v1389_v16 }
0x1a79   :  { %v2520_v19 = vpop.f32.mrf.mxu1 }
0x1a7a   :  { %2694 = vtanh.f32 %v1435_v18  ;;  %v2161_v24 = vmul.f32 -1.442695, %v1435_v18 }
0x1a7b   :  { %v1432_v20 = vpop.f32.mrf.mxu1 }
0x1a7c   :  { %2696 = vpow2.f32 %v2161_v24  ;;  %v1629_v24 = vunpack.c.h.bf16 %v1548_v63 }
0x1a7d   :  { %v2521_v21 = vpop.f32.mrf.mxu1 }
0x1a87   :  { %v2695_v22 = vpop.eup %2694 }
0x1a88   :  { %1445 = vrot.lane.b32.xlu1 %v2695_v22, %s2746_s28 }
0x1a89   :  { %v2697_v25 = vpop.eup %2696 }
0x1a8a   :  { %v1439_v26 = vadd.f32 1.0, %v2697_v25 }
0x1a8c   :  { %2698 = vrcp.f32 %v1439_v26 }
0x1a99   :  { %v2699_v48 = vpop.eup %2698 }
0x1a9a   :  { %v1443_v33 = vmul.f32 %v2699_v48, %v1373_v56 }
0x1afa   :  { %v1446_v13 = vpop.permute.xlu1 %1445 }
0x1afb   :  { %v1448_v29 = vmul.f32 %v2699_v48, %v1446_v13 }
0x1afd   :  { %1450 = vrot.lane.b32.xlu0 %v1448_v29, %s2746_s28 }
0x1b6f   :  { %v1451_v35 = vpop.permute.xlu0 %1450 }
0x1b70   :  { %v1453_v36 = vadd.f32 %v1451_v35, %v1443_v33 }
0x1b72   :  { %2700 = vtanh.f32 %v1453_v36 }
0x1b7f   :  { %v2701_v23 = vpop.eup %2700 }
0x1b80   :  { %1456 = vrot.lane.b32.xlu1 %v2701_v23, %s2746_s28 }
0x1bf2   :  { %v1457_v37 = vpop.permute.xlu1 %1456 }
0x1bf3   :  { %v1459_v34 = vmul.f32 %v2699_v48, %v1457_v37 }
0x1bf5   :  { %v3107_v38 = vpack.c.bf16 %v1459_v34, %v1459_v34 }
0x1bf7   :  { %1470 = vrot.lane.b32.xlu0 %v3107_v38, %s2747_s29 }
0x1c69   :  { %v1471_v39 = vpop.permute.xlu0 %1470 }
0x1c6a   :  { %2527 = vmatmul.mubr.msk.bf16.vlgmr.msra.gmra.mxu0 %vm248_vm13, %v1471_v39 }
0x1c6b   :  { %2539 = vmatpush3.bf16.msra.mxu0 %v3006_v28  ;;  %2542 = vmatprep.mubr.msk.bf16.mxu0 %vm2745_vm12, %v2744_v30 }
0x1c6c   :  { %2540 = vmatprep.subr.bf16.mxu0 %v2744_v30 }
0x1c6f   :  { %2541 = vmatpush3.bf16.msra.mxu0 %v3014_v44 }
0x1c70   :  { %2554 = vmatprep.subr.bf16.mxu0 %v2744_v30 }
0x1d2a   :  { %v1509_v42 = vpop.f32.mrf.mxu0 }
0x1d2b   :  { %v1515_v43 = vadd.f32 %v1509_v42, %v1469_v41 }
0x1d2c   :  { %v2528_v47 = vpop.f32.mrf.mxu0 }
0x1d2d   :  { %2702 = vtanh.f32 %v1515_v43  ;;  %v2164_v54 = vmul.f32 -1.442695, %v1515_v43 }
0x1d2e   :  { %v1512_v45 = vpop.f32.mrf.mxu0 }
0x1d2f   :  { %2704 = vpow2.f32 %v2164_v54 }
0x1d30   :  { %v2529_v46 = vpop.f32.mrf.mxu0 }
0x1d31   :  { %v1708_v46 = vld [vmem:[#allocation3 + $0x18] sm:$0xff]  }
0x1d3a   :  { %v2703_v49 = vpop.eup %2702 }
0x1d3b   :  { %1525 = vrot.lane.b32.xlu1 %v2703_v49, %s2746_s28  ;;  %v1709_v49 = vunpack.c.l.bf16 %v1708_v46 }
0x1d3c   :  { %v2705_v40 = vpop.eup %2704 }
0x1d3d   :  { %v1519_v50 = vadd.f32 1.0, %v2705_v40 }
0x1d3f   :  { %2706 = vrcp.f32 %v1519_v50 }
0x1d4c   :  { %v2707_v0 = vpop.eup %2706 }
0x1d4d   :  { %v1523_v53 = vmul.f32 %v2707_v0, %v1453_v36 }
0x1dad   :  { %v1526_v51 = vpop.permute.xlu1 %1525 }
0x1dae   :  { %v1528_v52 = vmul.f32 %v2707_v0, %v1526_v51 }
0x1db0   :  { %1530 = vrot.lane.b32.xlu0 %v1528_v52, %s2746_s28 }
0x1e22   :  { %v1531_v55 = vpop.permute.xlu0 %1530 }
0x1e23   :  { %v1533_v56 = vadd.f32 %v1531_v55, %v1523_v53 }
0x1e25   :  { %2708 = vtanh.f32 %v1533_v56 }
0x1e32   :  { %v2709_v57 = vpop.eup %2708 }
0x1e33   :  { %1536 = vrot.lane.b32.xlu1 %v2709_v57, %s2746_s28 }
0x1ea5   :  { %v1537_v59 = vpop.permute.xlu1 %1536 }
0x1ea6   :  { %v1539_v60 = vmul.f32 %v2707_v0, %v1537_v59 }
0x1ea8   :  { %v3121_v61 = vpack.c.bf16 %v1539_v60, %v1539_v60 }
0x1eaa   :  { %1550 = vrot.lane.b32.xlu0 %v3121_v61, %s2747_s29 }
0x1f1c   :  { %v1551_v31 = vpop.permute.xlu0 %1550 }
0x1f1d   :  { %2535 = vmatmul.mubr.msk.bf16.vlgmr.msra.gmra.mxu1 %vm248_vm13, %v1551_v31 }
0x1f1e   :  { %2547 = vmatpush3.bf16.msra.mxu1 %v3006_v28  ;;  %2550 = vmatprep.mubr.msk.bf16.mxu1 %vm2745_vm12, %v2744_v30 }
0x1f1f   :  { %2548 = vmatprep.subr.bf16.mxu1 %v2744_v30 }
0x1f22   :  { %2549 = vmatpush3.bf16.msra.mxu1 %v3014_v44 }
0x1fdd   :  { %v1589_v11 = vpop.f32.mrf.mxu1 }
0x1fde   :  { %v1595_v2 = vadd.f32 %v1589_v11, %v1549_v1 }
0x1fdf   :  { %v2536_v3 = vpop.f32.mrf.mxu1 }
0x1fe0   :  { %2710 = vtanh.f32 %v1595_v2  ;;  %v2167_v7 = vmul.f32 -1.442695, %v1595_v2 }
0x1fe1   :  { %v1592_v32 = vpop.f32.mrf.mxu1 }
0x1fe2   :  { %2712 = vpow2.f32 %v2167_v7 }
0x1fe3   :  { %v2537_v4 = vpop.f32.mrf.mxu1 }
0x1fed   :  { %v2711_v5 = vpop.eup %2710 }
0x1fee   :  { %1605 = vrot.lane.b32.xlu1 %v2711_v5, %s2746_s28  ;;  %v1789_v5 = vunpack.c.h.bf16 %v1708_v46 }
0x1fef   :  { %v2713_v8 = vpop.eup %2712 }
0x1ff0   :  { %v1599_v9 = vadd.f32 1.0, %v2713_v8 }
0x1ff2   :  { %2714 = vrcp.f32 %v1599_v9 }
0x1fff   :  { %v2715_v10 = vpop.eup %2714 }
0x2000   :  { %v1603_v15 = vmul.f32 %v2715_v10, %v1533_v56 }
0x2060   :  { %v1606_v12 = vpop.permute.xlu1 %1605 }
0x2061   :  { %v1608_v14 = vmul.f32 %v2715_v10, %v1606_v12 }
0x2063   :  { %1610 = vrot.lane.b32.xlu0 %v1608_v14, %s2746_s28 }
0x20d5   :  { %v1611_v16 = vpop.permute.xlu0 %1610 }
0x20d6   :  { %v1613_v17 = vadd.f32 %v1611_v16, %v1603_v15 }
0x20d8   :  { %2716 = vtanh.f32 %v1613_v17 }
0x20e5   :  { %v2717_v18 = vpop.eup %2716 }
0x20e6   :  { %1616 = vrot.lane.b32.xlu1 %v2717_v18, %s2746_s28 }
0x2158   :  { %v1617_v19 = vpop.permute.xlu1 %1616 }
0x2159   :  { %v1619_v20 = vmul.f32 %v2715_v10, %v1617_v19 }
0x215b   :  { %v3134_v21 = vpack.c.bf16 %v1619_v20, %v1619_v20 }
0x215d   :  { %1630 = vrot.lane.b32.xlu0 %v3134_v21, %s2747_s29 }
0x21cf   :  { %v1631_v22 = vpop.permute.xlu0 %1630 }
0x21d0   :  { %2543 = vmatmul.mubr.msk.bf16.vlgmr.msra.gmra.mxu0 %vm248_vm13, %v1631_v22 }
0x21d1   :  { %2555 = vmatpush3.bf16.msra.mxu0 %v3006_v28  ;;  %2558 = vmatprep.mubr.msk.bf16.mxu0 %vm2745_vm12, %v2744_v30 }
0x21d2   :  { %2556 = vmatprep.subr.bf16.mxu0 %v2744_v30 }
0x21d5   :  { %2557 = vmatpush3.bf16.msra.mxu0 %v3014_v44 }
0x2290   :  { %v1669_v25 = vpop.f32.mrf.mxu0 }
0x2291   :  { %v1675_v26 = vadd.f32 %v1669_v25, %v1629_v24 }
0x2292   :  { %v2544_v48 = vpop.f32.mrf.mxu0 }
0x2293   :  { %2718 = vtanh.f32 %v1675_v26  ;;  %v2170_v35 = vmul.f32 -1.442695, %v1675_v26 }
0x2294   :  { %v1672_v13 = vpop.f32.mrf.mxu0 }
0x2295   :  { %2720 = vpow2.f32 %v2170_v35 }
0x2296   :  { %v2545_v29 = vpop.f32.mrf.mxu0 }
0x22a0   :  { %v2719_v33 = vpop.eup %2718 }
0x22a1   :  { %1685 = vrot.lane.b32.xlu1 %v2719_v33, %s2746_s28 }
0x22a2   :  { %v2721_v28 = vpop.eup %2720 }
0x22a3   :  { %v1679_v36 = vadd.f32 1.0, %v2721_v28 }
0x22a5   :  { %2722 = vrcp.f32 %v1679_v36 }
0x22b2   :  { %v2723_v23 = vpop.eup %2722 }
0x22b3   :  { %v1683_v44 = vmul.f32 %v2723_v23, %v1613_v17 }
0x2313   :  { %v1686_v37 = vpop.permute.xlu1 %1685 }
0x2314   :  { %v1688_v30 = vmul.f32 %v2723_v23, %v1686_v37 }
0x2316   :  { %1690 = vrot.lane.b32.xlu0 %v1688_v30, %s2746_s28 }
0x2388   :  { %v1691_v34 = vpop.permute.xlu0 %1690 }
0x2389   :  { %v1693_v39 = vadd.f32 %v1691_v34, %v1683_v44 }
0x238b   :  { %2724 = vtanh.f32 %v1693_v39 }
0x2398   :  { %v2725_v41 = vpop.eup %2724 }
0x2399   :  { %1696 = vrot.lane.b32.xlu1 %v2725_v41, %s2746_s28 }
0x240b   :  { %v1697_v42 = vpop.permute.xlu1 %1696 }
0x240c   :  { %v1699_v43 = vmul.f32 %v2723_v23, %v1697_v42 }
0x240e   :  { %v3147_v47 = vpack.c.bf16 %v1699_v43, %v1699_v43 }
0x2410   :  { %1710 = vrot.lane.b32.xlu0 %v3147_v47, %s2747_s29 }
0x2482   :  { %v1711_v45 = vpop.permute.xlu0 %1710 }
0x2483   :  { %2551 = vmatmul.mubr.msk.bf16.vlgmr.msra.gmra.mxu1 %vm248_vm13, %v1711_v45  ;;  %v2180_v45 = vld [vmem:[%s3234_s6] ss:$0 sm:$0xff] }
0x2543   :  { %v1749_v54 = vpop.f32.mrf.mxu1 }
0x2544   :  { %v1755_v40 = vadd.f32 %v1749_v54, %v1709_v49 }
0x2545   :  { %v2552_v50 = vpop.f32.mrf.mxu1 }
0x2546   :  { %2726 = vtanh.f32 %v1755_v40  ;;  %v2173_v53 = vmul.f32 -1.442695, %v1755_v40 }
0x2547   :  { %v1752_v0 = vpop.f32.mrf.mxu1 }
0x2548   :  { %2728 = vpow2.f32 %v2173_v53 }
0x2549   :  { %v2553_v51 = vpop.f32.mrf.mxu1 }
0x2553   :  { %v2727_v52 = vpop.eup %2726 }
0x2554   :  { %1765 = vrot.lane.b32.xlu1 %v2727_v52, %s2746_s28 }
0x2555   :  { %v2729_v55 = vpop.eup %2728 }
0x2556   :  { %v1759_v56 = vadd.f32 1.0, %v2729_v55 }
0x2558   :  { %2730 = vrcp.f32 %v1759_v56 }
0x2565   :  { %v2731_v57 = vpop.eup %2730 }
0x2566   :  { %v1763_v31 = vmul.f32 %v2731_v57, %v1693_v39 }
0x25c6   :  { %v1766_v59 = vpop.permute.xlu1 %1765 }
0x25c7   :  { %v1768_v60 = vmul.f32 %v2731_v57, %v1766_v59 }
0x25c9   :  { %1770 = vrot.lane.b32.xlu0 %v1768_v60, %s2746_s28 }
0x263b   :  { %v1771_v63 = vpop.permute.xlu0 %1770 }
0x263c   :  { %v1773_v1 = vadd.f32 %v1771_v63, %v1763_v31 }
0x263e   :  { %2732 = vtanh.f32 %v1773_v1 }
0x264b   :  { %v2733_v11 = vpop.eup %2732 }
0x264c   :  { %1776 = vrot.lane.b32.xlu1 %v2733_v11, %s2746_s28 }
0x26be   :  { %v1777_v2 = vpop.permute.xlu1 %1776 }
0x26bf   :  { %v1779_v3 = vmul.f32 %v2731_v57, %v1777_v2 }
0x26c1   :  { %v1780_v32 = vpack.c.bf16 %v1779_v3, %v1779_v3 }
0x26c3   :  { %1790 = vrot.lane.b32.xlu0 %v1780_v32, %s2747_s29 }
0x2735   :  { %v1791_v4 = vpop.permute.xlu0 %1790 }
0x2736   :  { %2559 = vmatmul.mubr.msk.bf16.vlgmr.msra.gmra.mxu0 %vm248_vm13, %v1791_v4 }
0x27f6   :  { %v1829_v7 = vpop.f32.mrf.mxu0 }
0x27f7   :  { %v1835_v8 = vadd.f32 %v1829_v7, %v1789_v5 }
0x27f8   :  { %v2560_v9 = vpop.f32.mrf.mxu0 }
0x27f9   :  { %2734 = vtanh.f32 %v1835_v8  ;;  %v2176_v15 = vmul.f32 -1.442695, %v1835_v8 }
0x27fa   :  { %v1832_v10 = vpop.f32.mrf.mxu0 }
0x27fb   :  { %2736 = vpow2.f32 %v2176_v15 }
0x27fc   :  { %v2561_v12 = vpop.f32.mrf.mxu0 }
0x2806   :  { %v2735_v14 = vpop.eup %2734 }
0x2807   :  { %1845 = vrot.lane.b32.xlu1 %v2735_v14, %s2746_s28 }
0x2808   :  { %v2737_v16 = vpop.eup %2736 }
0x2809   :  { %v1839_v17 = vadd.f32 1.0, %v2737_v16 }
0x280b   :  { %2738 = vrcp.f32 %v1839_v17 }
0x2818   :  { %v2739_v18 = vpop.eup %2738 }
0x2819   :  { %v1843_v22 = vmul.f32 %v2739_v18, %v1773_v1 }
0x2879   :  { %v1846_v19 = vpop.permute.xlu1 %1845 }
0x287a   :  { %v1848_v20 = vmul.f32 %v2739_v18, %v1846_v19 }
0x287c   :  { %1850 = vrot.lane.b32.xlu0 %v1848_v20, %s2746_s28 }
0x2880   :  { %1304 = vrot.lane.b32.xlu0 %v3049_v27, %s2747_s29  ;;  %v2608_v27 = vld [vmem:[%s3231_s5 + $0x8] sm:$0xff]  }
0x2881   :  { %2562 = vmatprep.subr.bf16.mxu1 %v2608_v27 }
0x2882   :  { %2563 = vmatpush3.bf16.msra.mxu1 %v2608_v27 }
0x2884   :  { %1464 = vrot.lane.b32.xlu0 %v3107_v38, %s2747_s29 }
0x2888   :  { %1624 = vrot.lane.b32.xlu0 %v3134_v21, %s2747_s29  ;;  %v2609_v21 = vld [vmem:[%s3231_s5] sm:$0xff]   ;;  %s2748_s5 = smov 96  }
0x2889   :  { %2564 = vmatprep.subr.bf16.mxu1 %v2609_v21 }
0x288a   :  { %2565 = vmatpush3.bf16.msra.mxu1 %v2609_v21 }
0x288c   :  { %1784 = vrot.lane.b32.xlu0 %v1780_v32, %s2747_s29 }
0x28ee   :  { %v1851_v24 = vpop.permute.xlu0 %1850 }
0x28ef   :  { %v1853_v25 = vadd.f32 %v1851_v24, %v1843_v22 }
0x28f1   :  { %2740 = vtanh.f32 %v1853_v25 }
0x28f2   :  { %v1305_v26 = vpop.permute.xlu0 %1304 }
0x28f3   :  { %1307 = vst.msk [vmem:[#allocation2] sm:$0xf] %vm459_vm14, %v1305_v26 }
0x28f6   :  { %v1465_v48 = vpop.permute.xlu0 %1464 }
0x28f7   :  { %1467 = vst.msk [vmem:[#allocation2 + $0x8] sm:$0xf] %vm459_vm14, %v1465_v48 }
0x28fa   :  { %v1625_v38 = vpop.permute.xlu0 %1624 }
0x28fb   :  { %1627 = vst.msk [vmem:[#allocation2 + $0x10] sm:$0xf] %vm459_vm14, %v1625_v38 }
0x28fe   :  { %v2741_v13 = vpop.eup %2740  ;;  %v1785_v29 = vpop.permute.xlu0 %1784 }
0x28ff   :  { %1787 = vst.msk [vmem:[#allocation2 + $0x18] sm:$0xf] %vm459_vm14, %v1785_v29  ;;  %1856 = vrot.lane.b32.xlu1 %v2741_v13, %s2746_s28 }
0x2903   :  { %1384 = vrot.lane.b32.xlu1 %v3083_v62, %s2747_s29 }
0x2907   :  { %1544 = vrot.lane.b32.xlu1 %v3121_v61, %s2747_s29 }
0x290b   :  { %1704 = vrot.lane.b32.xlu1 %v3147_v47, %s2747_s29 }
0x2971   :  { %v1857_v33 = vpop.permute.xlu1 %1856 }
0x2972   :  { %v1859_v35 = vmul.f32 %v2739_v18, %v1857_v33 }
0x2974   :  { %v1860_v28 = vpack.c.bf16 %v1859_v35, %v1859_v35  ;;  %v2583_v23 = vpack.i.bf16 %v1859_v35, %v3076_v58 }
0x2975   :  { %v1385_v36 = vpop.permute.xlu1 %1384 }
0x2976   :  { %1387 = vst.msk [vmem:[#allocation2 + $0x4] sm:$0xf] %vm459_vm14, %v1385_v36  ;;  %1864 = vrot.lane.b32.xlu1 %v1860_v28, %s2747_s29  ;;  %2584 = vrot.lane.b32.xlu0 %v2583_v23, %s2747_s29 }
0x2979   :  { %v1545_v37 = vpop.permute.xlu1 %1544 }
0x297a   :  { %1547 = vst.msk [vmem:[#allocation2 + $0xc] sm:$0xf] %vm459_vm14, %v1545_v37  ;;  %1042 = vrot.lane.b32.xlu1 %v3059_v6, %s2748_s5  ;;  %1876 = vrot.lane.b32.xlu0 %v1853_v25, %s2748_s5 }
0x297d   :  { %v1705_v62 = vpop.permute.xlu1 %1704  ;;  %v2610_v61 = vld [vmem:[#allocation2] sm:$0xff]  }
0x297e   :  { %1707 = vst.msk [vmem:[#allocation2 + $0x14] sm:$0xf] %vm459_vm14, %v1705_v62  ;;  %2566 = vmatprep.mubr.msk.bf16.mxu1 %vm248_vm13, %v2610_v61 }
0x2981   :  { %v2611_v30 = vld [vmem:[#allocation2 + $0x8] sm:$0xff]  }
0x2982   :  { %2567 = vmatmul.mubr.msk.bf16.vlgmr.msra.gmra.mxu1 %vm248_vm13, %v2611_v30 }
0x2985   :  { %v2612_v44 = vld [vmem:[#allocation2 + $0x10] sm:$0xff]  }
0x2986   :  { %2570 = vmatprep.mubr.msk.bf16.mxu1 %vm248_vm13, %v2612_v44 }
0x29e8   :  { %v1865_v58 = vpop.permute.xlu1 %1864  ;;  %v2585_v34 = vpop.permute.xlu0 %2584 }
0x29e9   :  { %1867 = vst.msk [vmem:[#allocation2 + $0x1c] sm:$0xf] %vm459_vm14, %v1865_v58  ;;  %v2587_v39 = vunpack.i.h.bf16 %v2585_v34  ;;  %v2586_v41 = vunpack.i.l.bf16 %v2585_v34 }
0x29eb   :  { %2178 = vst.msk [vmem:[%s3233_s8 + $0x8] sm:$0xff] %vm248_vm13, %v2587_v39  ;;  %1040 = vst.msk [vmem:[%s3233_s8] sm:$0xff] %vm248_vm13, %v2586_v41 }
0x29ec   :  { %v1043_v6 = vpop.permute.xlu1 %1042  ;;  %v1877_v42 = vpop.permute.xlu0 %1876 }
0x29ed   :  { %1045 = vst.msk [vmem:[%s3232_s9] sm:$0xff] %vm248_vm13, %v1043_v6  ;;  %2179 = vst.msk [vmem:[%s3232_s9 + $0x8] sm:$0xff] %vm248_vm13, %v1877_v42 }
0x29f0   :  { %v2613_v43 = vld [vmem:[#allocation2 + $0x18] sm:$0xff]  }
0x29f1   :  { %2571 = vmatmul.mubr.msk.bf16.gmra.mxu1 %vm248_vm13, %v2613_v43 }
0x2a42   :  { %v2568_v47 = vpop.f32.mrf.mxu1 }
0x2a43   :  { %v1987_v54 = vadd.f32 %v2568_v47, %v2180_v45 }
0x2a44   :  { %v1978_v46 = vpop.f32.mrf.mxu1 }
0x2a45   :  { %v1979_v0 = vadd.f32 %v2180_v45, %v1978_v46 }
0x2a46   :  { %v2569_v49 = vpop.f32.mrf.mxu1 }
0x2a47   :  { %v1990_v40 = vadd.f32 %v2569_v49, %v2180_v45 }
0x2a48   :  { %v1981_v50 = vpop.f32.mrf.mxu1 }
0x2a49   :  { %v2287_v51 = vpack.c.bf16 %v1990_v40, %v1987_v54  ;;  %v1982_v52 = vadd.f32 %v2180_v45, %v1981_v50 }
0x2a4b   :  { %2305 = vst [vmem:[%s3235_s7 + $0x8] sm:$0xff] %v2287_v51   ;;  %v2282_v53 = vpack.c.bf16 %v1982_v52, %v1979_v0 }
0x2a4d   :  { %2283 = vst [vmem:[%s3235_s7] sm:$0xff] %v2282_v53  }
0x2ab1   :  { %v2572_v55 = vpop.f32.mrf.mxu1 }
0x2ab2   :  { %v2003_v59 = vadd.f32 %v2572_v55, %v2180_v45 }
0x2ab3   :  { %v1994_v56 = vpop.f32.mrf.mxu1 }
0x2ab4   :  { %v1995_v63 = vadd.f32 %v2180_v45, %v1994_v56 }
0x2ab5   :  { %v2573_v57 = vpop.f32.mrf.mxu1 }
0x2ab6   :  { %v2006_v60 = vadd.f32 %v2573_v57, %v2180_v45 }
0x2ab7   :  { %v1997_v31 = vpop.f32.mrf.mxu1 }
0x2ab8   :  { %v2297_v1 = vpack.c.bf16 %v2006_v60, %v2003_v59  ;;  %v1998_v11 = vadd.f32 %v2180_v45, %v1997_v31 }
0x2aba   :  { %2307 = vst [vmem:[%s3235_s7 + $0x18] sm:$0xff] %v2297_v1   ;;  %v2292_v2 = vpack.c.bf16 %v1998_v11, %v1995_v63 }
0x2abc   :  { %2306 = vst [vmem:[%s3235_s7 + $0x10] sm:$0xff] %v2292_v2  }

</bundles_post_ra>
